<compile_context>
chip_gen: v6e
topology: v6e:2x2x1
jax: 0.10.0
libtpu: 0.0.40
codegen_flags: <defaults>
</compile_context>

<pallas_src>
import functools

import jax
import jax.numpy as jnp
from jax.experimental import pallas as pl
from jax.experimental.pallas import tpu as pltpu


def _crpe_kernel(q_ref, v_ref, w_ref, b_ref, o_ref, vpad_ref, *, H, W, K, Ch):
    """Fused depthwise KxK conv + bias + multiply-by-q for ONE (batch, head)
    slab, computed directly in the native (token, Ch) layout.

    q_ref    : (1, 1, N, Ch)  q slab   (N = 1 + H*W, token 0 = class token)
    v_ref    : (1, 1, N, Ch)  v slab
    w_ref    : (1, K*K, Ch)   per-head filter taps, row-major (ky, kx)
    b_ref    : (1, 1, Ch)     per-head bias
    o_ref    : (1, 1, N, Ch)  out: row 0 = 0, rows 1.. = (conv(v)+b)*q
    vpad_ref : (H*W + 2*(p*W+p), Ch) f32 scratch = zero-padded token axis
    """
    p = K // 2
    HW = H * W
    off = p * W + p  # top/bottom halo length along the flattened token axis

    # ---- stage image tokens of v into the zero-padded VMEM scratch ----
    # (in-kernel halo handling: no HBM jnp.pad, no monolithic padded load)
    vpad_ref[pl.ds(0, off), :] = jnp.zeros((off, Ch), jnp.float32)
    vpad_ref[pl.ds(off + HW, off), :] = jnp.zeros((off, Ch), jnp.float32)
    vpad_ref[pl.ds(off, HW), :] = v_ref[0, 0, pl.ds(1, HW), :].astype(jnp.float32)

    # x (column) coordinate of every image token, for masking the wrap-around
    # of the flattened token axis at the left/right image borders.
    x = jax.lax.broadcasted_iota(jnp.int32, (HW, Ch), 0) % W

    # Accumulator initialised with the broadcast bias (drops the separate add).
    bias = b_ref[0, 0, :].astype(jnp.float32)                    # (Ch,)
    acc = jnp.broadcast_to(bias[None, :], (HW, Ch))

    # K*K tap loop.  Each tap is a static-offset ref slice of the padded
    # scratch (sublane address offset only -> loads stream, no shuffles).
    # The column-boundary mask depends only on dj, so it is hoisted out of
    # the di loop and applied once per dj to the partial sum.
    for dj in range(K):
        part = vpad_ref[pl.ds(dj, HW), :] * w_ref[0, dj, :].astype(jnp.float32)
        for di in range(1, K):
            part = part + (vpad_ref[pl.ds(di * W + dj, HW), :]
                           * w_ref[0, di * K + dj, :].astype(jnp.float32))
        if dj == p:                                  # centre column: never OOB
            acc = acc + part
        else:
            col_ok = jnp.logical_and(x + (dj - p) >= 0, x + (dj - p) < W)
            acc = acc + jnp.where(col_ok, part, 0.0)

    out = acc * q_ref[0, 0, pl.ds(1, HW), :].astype(jnp.float32)

    # Fused output: zero class-token row + image rows (no wrapper concat).
    o_ref[0, 0, pl.ds(0, 1), :] = jnp.zeros((1, Ch), o_ref.dtype)
    o_ref[0, 0, pl.ds(1, HW), :] = out.astype(o_ref.dtype)


class ConvRelPosEnc:
    """JAX/Pallas port of the PyTorch ConvRelPosEnc module."""

    def __init__(self, Ch, h, window, key):
        if isinstance(window, int):
            window = {window: h}
        elif not isinstance(window, dict):
            raise ValueError()
        self.Ch = Ch
        self.h = h
        self.window = window
        self.head_splits = list(window.values())
        self.window_sizes = list(window.keys())
        self.channel_splits = [s * Ch for s in self.head_splits]
        assert sum(self.head_splits) == h
        for K in self.window_sizes:
            assert K % 2 == 1

        # Deterministic parameter init mirroring torch Conv2d defaults
        # (depthwise: fan_in = 1*K*K).  Stored per split as (K, K, C) with
        # channel index = local_head*Ch + ch, matching the PyTorch
        # 'B h (H W) Ch -> B (h Ch) H W' rearrange + channel split.
        self.weights, self.biases = [], []
        for K, C in zip(self.window_sizes, self.channel_splits):
            key, wk, bk = jax.random.split(key, 3)
            bound = 1.0 / (K * K) ** 0.5
            self.weights.append(
                jax.random.uniform(wk, (K, K, C), jnp.float32, -bound, bound))
            self.biases.append(
                jax.random.uniform(bk, (C,), jnp.float32, -bound, bound))

        # Pack per-head filters once: zero-pad every KxK filter to Kmax x Kmax
        # (centre aligned => identical 'same'-conv result), so a single
        # pallas_call covers all window-size splits.
        Kmax = max(self.window_sizes)
        w_heads, b_heads = [], []
        for K, split, w, b in zip(self.window_sizes, self.head_splits,
                                  self.weights, self.biases):
            pad = (Kmax - K) // 2
            wp = jnp.pad(w, ((pad, pad), (pad, pad), (0, 0)))      # (Kmax,Kmax,C)
            wp = wp.reshape(Kmax, Kmax, split, Ch)
            wp = jnp.transpose(wp, (2, 0, 1, 3))                   # (split,Kmax,Kmax,Ch)
            w_heads.append(wp.reshape(split, Kmax * Kmax, Ch))
            b_heads.append(b.reshape(split, 1, Ch))
        self.Kmax = Kmax
        self.w_packed = jnp.concatenate(w_heads, axis=0)           # (h, Kmax*Kmax, Ch)
        self.b_packed = jnp.concatenate(b_heads, axis=0)           # (h, 1, Ch)

    def __call__(self, q, v, size):
        B, h, N, Ch = q.shape
        H, W = size
        assert N == 1 + H * W
        assert h == self.h and Ch == self.Ch
        K = self.Kmax
        p = K // 2
        HW = H * W
        off = p * W + p

        kernel = functools.partial(_crpe_kernel, H=H, W=W, K=K, Ch=Ch)
        itemsize = q.dtype.itemsize
        cost = pl.CostEstimate(
            flops=2 * K * K * B * h * HW * Ch + 2 * B * h * HW * Ch,
            transcendentals=0,
            bytes_accessed=3 * B * h * N * Ch * itemsize + int(self.w_packed.size) * 4,
        )
        # NOTE: for production-size H*W on v7x (64 MiB VMEM, 2 TCs), add an
        # H-strip grid axis with a (K-1)-row halo and set vmem_limit_bytes;
        # at these whole-image block sizes the default budget is ample.
        return pl.pallas_call(
            kernel,
            out_shape=jax.ShapeDtypeStruct((B, h, N, Ch), q.dtype),
            grid_spec=pltpu.PrefetchScalarGridSpec(
                num_scalar_prefetch=0,
                grid=(B, h),
                in_specs=[
                    pl.BlockSpec((1, 1, N, Ch), lambda b, i: (b, i, 0, 0)),
                    pl.BlockSpec((1, 1, N, Ch), lambda b, i: (b, i, 0, 0)),
                    pl.BlockSpec((1, K * K, Ch), lambda b, i: (i, 0, 0)),
                    pl.BlockSpec((1, 1, Ch), lambda b, i: (i, 0, 0)),
                ],
                out_specs=pl.BlockSpec((1, 1, N, Ch), lambda b, i: (b, i, 0, 0)),
                scratch_shapes=[pltpu.VMEM((HW + 2 * off, Ch), jnp.float32)],
            ),
            compiler_params=pltpu.CompilerParams(
                dimension_semantics=("parallel", "parallel")),
            cost_estimate=cost,
        )(q, v, self.w_packed, self.b_packed)


def _reference(module, q, v, size):
    """Pure-JAX reference (lax depthwise conv) for a correctness check only."""
    B, h, N, Ch = q.shape
    H, W = size
    q_img = q[:, :, 1:, :].reshape(B, h, H, W, Ch)
    v_img = v[:, :, 1:, :].reshape(B, h, H, W, Ch)
    q_nhwc = jnp.transpose(q_img, (0, 2, 3, 1, 4)).reshape(B, H, W, h * Ch)
    v_nhwc = jnp.transpose(v_img, (0, 2, 3, 1, 4)).reshape(B, H, W, h * Ch)
    outs, c0 = [], 0
    for K, C, wgt, bias in zip(module.window_sizes, module.channel_splits,
                               module.weights, module.biases):
        v_s = v_nhwc[..., c0:c0 + C]
        q_s = q_nhwc[..., c0:c0 + C]
        rhs = wgt.reshape(K, K, 1, C)
        conv = jax.lax.conv_general_dilated(
            v_s, rhs, window_strides=(1, 1), padding="SAME",
            dimension_numbers=("NHWC", "HWIO", "NHWC"),
            feature_group_count=C)
        outs.append((conv + bias) * q_s)
        c0 += C
    ev = jnp.concatenate(outs, axis=-1).reshape(B, H, W, h, Ch)
    ev = jnp.transpose(ev, (0, 3, 1, 2, 4)).reshape(B, h, H * W, Ch)
    zero = jnp.zeros((B, h, 1, Ch), dtype=q.dtype)
    return jnp.concatenate((zero, ev), axis=2)


if __name__ == "__main__":
    key = jax.random.PRNGKey(0)
    B, h, Ch, H, W = 2, 3, 8, 8, 8
    N = 1 + H * W
    window = {3: 2, 5: 1}   # two window-size splits: 2 heads @ 3x3, 1 head @ 5x5

    key, pkey, qkey, vkey = jax.random.split(key, 4)
    module = ConvRelPosEnc(Ch, h, window, pkey)
    q = jax.random.normal(qkey, (B, h, N, Ch), jnp.float32)
    v = jax.random.normal(vkey, (B, h, N, Ch), jnp.float32)

    out = module(q, v, (H, W))
    jax.block_until_ready(out)

    ref = _reference(module, q, v, (H, W))
    assert out.shape == (B, h, N, Ch)
    assert jnp.allclose(out, ref, atol=1e-4, rtol=1e-4)

    print("KERNEL_OK")
</pallas_src>

<mosaic_0001>
module attributes {stable_mosaic.version = 11 : i64} {
  func.func @_crpe_kernel(%arg0: i32, %arg1: i32, %arg2: memref<1x1x65x8xf32, #tpu.memory_space<vmem>>, %arg3: memref<1x1x65x8xf32, #tpu.memory_space<vmem>>, %arg4: memref<1x25x8xf32, #tpu.memory_space<vmem>>, %arg5: memref<1x1x8xf32, #tpu.memory_space<vmem>>, %arg6: memref<1x1x65x8xf32, #tpu.memory_space<vmem>>, %arg7: memref<100x8xf32, #tpu.memory_space<vmem>>) attributes {dimension_semantics = [#tpu.dimension_semantics<parallel>, #tpu.dimension_semantics<parallel>], iteration_bounds = array<i64: 2, 3>, scalar_prefetch = 0 : i64, scratch_operands = 1 : i64, tpu.core_type = #tpu.core_type<tc>, window_params = [{transform_indices = @transform_0, window_bounds = array<i64: 1, 1, 65, 8>}, {transform_indices = @transform_1, window_bounds = array<i64: 1, 1, 65, 8>}, {transform_indices = @transform_2, window_bounds = array<i64: 1, 25, 8>}, {transform_indices = @transform_3, window_bounds = array<i64: 1, 1, 8>}, {transform_indices = @transform_4, window_bounds = array<i64: 1, 1, 65, 8>}]} {
    %cst = arith.constant 0.000000e+00 : f32
    %0 = vector.broadcast %cst : f32 to vector<18x8xf32>
    %c0 = arith.constant 0 : index
    %c0_0 = arith.constant 0 : index
    %1 = vector.load %arg7[%c0, %c0_0] : memref<100x8xf32, #tpu.memory_space<vmem>>, vector<18x8xf32>
    tpu.vector_store %arg7[%c0, %c0_0], %0 {strides = array<i32>} : memref<100x8xf32, #tpu.memory_space<vmem>>, vector<18x8xf32>,
    %cst_1 = arith.constant 0.000000e+00 : f32
    %2 = vector.broadcast %cst_1 : f32 to vector<18x8xf32>
    %c82 = arith.constant 82 : index
    %c0_2 = arith.constant 0 : index
    %3 = vector.load %arg7[%c82, %c0_2] : memref<100x8xf32, #tpu.memory_space<vmem>>, vector<18x8xf32>
    tpu.vector_store %arg7[%c82, %c0_2], %2 {strides = array<i32>} : memref<100x8xf32, #tpu.memory_space<vmem>>, vector<18x8xf32>,
    %c0_3 = arith.constant 0 : index
    %c0_4 = arith.constant 0 : index
    %c1 = arith.constant 1 : index
    %c0_5 = arith.constant 0 : index
    %4 = vector.load %arg3[%c0_3, %c0_4, %c1, %c0_5] : memref<1x1x65x8xf32, #tpu.memory_space<vmem>>, vector<1x1x64x8xf32>
    %5 = vector.shape_cast %4 : vector<1x1x64x8xf32> to vector<64x8xf32>
    %c18 = arith.constant 18 : index
    %c0_6 = arith.constant 0 : index
    %6 = vector.load %arg7[%c18, %c0_6] : memref<100x8xf32, #tpu.memory_space<vmem>>, vector<64x8xf32>
    tpu.vector_store %arg7[%c18, %c0_6], %5 {strides = array<i32>} : memref<100x8xf32, #tpu.memory_space<vmem>>, vector<64x8xf32>,
    %7 = tpu.iota {dimensions = array<i32: 0>} : vector<64x8xi32>
    %c8_i32 = arith.constant 8 : i32
    %c0_i32 = arith.constant 0 : i32
    %8 = arith.cmpi eq, %c8_i32, %c0_i32 : i32
    %c1_i32 = arith.constant 1 : i32
    %9 = arith.select %8, %c1_i32, %c8_i32 : i32
    %10 = vector.broadcast %9 : i32 to vector<64x8xi32>
    %11 = arith.remsi %7, %10 : vector<64x8xi32>
    %c0_i32_7 = arith.constant 0 : i32
    %12 = vector.broadcast %c0_i32_7 : i32 to vector<64x8xi32>
    %13 = arith.cmpi ne, %11, %12 : vector<64x8xi32>
    %c0_i32_8 = arith.constant 0 : i32
    %14 = vector.broadcast %c0_i32_8 : i32 to vector<64x8xi32>
    %15 = arith.cmpi slt, %11, %14 : vector<64x8xi32>
    %c0_i32_9 = arith.constant 0 : i32
    %16 = arith.cmpi slt, %9, %c0_i32_9 : i32
    %17 = vector.broadcast %16 : i1 to vector<64x8xi1>
    %18 = vector.broadcast %17 : vector<64x8xi1> to vector<64x8xi1>
    %19 = arith.xori %15, %18 : vector<64x8xi1>
    %20 = arith.andi %19, %13 : vector<64x8xi1>
    %21 = vector.broadcast %9 : i32 to vector<64x8xi32>
    %22 = arith.addi %11, %21 : vector<64x8xi32>
    %23 = arith.select %20, %22, %11 : vector<64x8xi1>, vector<64x8xi32>
    %c0_10 = arith.constant 0 : index
    %c0_11 = arith.constant 0 : index
    %c0_12 = arith.constant 0 : index
    %24 = vector.load %arg5[%c0_10, %c0_11, %c0_12] : memref<1x1x8xf32, #tpu.memory_space<vmem>>, vector<1x1x8xf32>
    %25 = vector.shape_cast %24 : vector<1x1x8xf32> to vector<8xf32>
    %26 = vector.shape_cast %25 : vector<8xf32> to vector<1x8xf32>
    %27 = vector.shape_cast %26 : vector<1x8xf32> to vector<1x8xf32>
    %28 = vector.broadcast %27 : vector<1x8xf32> to vector<64x8xf32>
    %c0_13 = arith.constant 0 : index
    %c0_14 = arith.constant 0 : index
    %29 = vector.load %arg7[%c0_13, %c0_14] : memref<100x8xf32, #tpu.memory_space<vmem>>, vector<64x8xf32>
    %c0_15 = arith.constant 0 : index
    %c0_16 = arith.constant 0 : index
    %c0_17 = arith.constant 0 : index
    %30 = vector.load %arg4[%c0_15, %c0_16, %c0_17] : memref<1x25x8xf32, #tpu.memory_space<vmem>>, vector<1x1x8xf32>
    %31 = vector.shape_cast %30 : vector<1x1x8xf32> to vector<8xf32>
    %32 = vector.shape_cast %31 : vector<8xf32> to vector<1x8xf32>
    %33 = vector.broadcast %32 : vector<1x8xf32> to vector<64x8xf32>
    %34 = arith.mulf %29, %33 : vector<64x8xf32>
    %c8 = arith.constant 8 : index
    %c0_18 = arith.constant 0 : index
    %35 = vector.load %arg7[%c8, %c0_18] : memref<100x8xf32, #tpu.memory_space<vmem>>, vector<64x8xf32>
    %c0_19 = arith.constant 0 : index
    %c5 = arith.constant 5 : index
    %c0_20 = arith.constant 0 : index
    %36 = vector.load %arg4[%c0_19, %c5, %c0_20] : memref<1x25x8xf32, #tpu.memory_space<vmem>>, vector<1x1x8xf32>
    %37 = vector.shape_cast %36 : vector<1x1x8xf32> to vector<8xf32>
    %38 = vector.shape_cast %37 : vector<8xf32> to vector<1x8xf32>
    %39 = vector.broadcast %38 : vector<1x8xf32> to vector<64x8xf32>
    %40 = arith.mulf %35, %39 : vector<64x8xf32>
    %41 = arith.addf %34, %40 : vector<64x8xf32>
    %c16 = arith.constant 16 : index
    %c0_21 = arith.constant 0 : index
    %42 = vector.load %arg7[%c16, %c0_21] : memref<100x8xf32, #tpu.memory_space<vmem>>, vector<64x8xf32>
    %c0_22 = arith.constant 0 : index
    %c10 = arith.constant 10 : index
    %c0_23 = arith.constant 0 : index
    %43 = vector.load %arg4[%c0_22, %c10, %c0_23] : memref<1x25x8xf32, #tpu.memory_space<vmem>>, vector<1x1x8xf32>
    %44 = vector.shape_cast %43 : vector<1x1x8xf32> to vector<8xf32>
    %45 = vector.shape_cast %44 : vector<8xf32> to vector<1x8xf32>
    %46 = vector.broadcast %45 : vector<1x8xf32> to vector<64x8xf32>
    %47 = arith.mulf %42, %46 : vector<64x8xf32>
    %48 = arith.addf %41, %47 : vector<64x8xf32>
    %c24 = arith.constant 24 : index
    %c0_24 = arith.constant 0 : index
    %49 = vector.load %arg7[%c24, %c0_24] : memref<100x8xf32, #tpu.memory_space<vmem>>, vector<64x8xf32>
    %c0_25 = arith.constant 0 : index
    %c15 = arith.constant 15 : index
    %c0_26 = arith.constant 0 : index
    %50 = vector.load %arg4[%c0_25, %c15, %c0_26] : memref<1x25x8xf32, #tpu.memory_space<vmem>>, vector<1x1x8xf32>
    %51 = vector.shape_cast %50 : vector<1x1x8xf32> to vector<8xf32>
    %52 = vector.shape_cast %51 : vector<8xf32> to vector<1x8xf32>
    %53 = vector.broadcast %52 : vector<1x8xf32> to vector<64x8xf32>
    %54 = arith.mulf %49, %53 : vector<64x8xf32>
    %55 = arith.addf %48, %54 : vector<64x8xf32>
    %c32 = arith.constant 32 : index
    %c0_27 = arith.constant 0 : index
    %56 = vector.load %arg7[%c32, %c0_27] : memref<100x8xf32, #tpu.memory_space<vmem>>, vector<64x8xf32>
    %c0_28 = arith.constant 0 : index
    %c20 = arith.constant 20 : index
    %c0_29 = arith.constant 0 : index
    %57 = vector.load %arg4[%c0_28, %c20, %c0_29] : memref<1x25x8xf32, #tpu.memory_space<vmem>>, vector<1x1x8xf32>
    %58 = vector.shape_cast %57 : vector<1x1x8xf32> to vector<8xf32>
    %59 = vector.shape_cast %58 : vector<8xf32> to vector<1x8xf32>
    %60 = vector.broadcast %59 : vector<1x8xf32> to vector<64x8xf32>
    %61 = arith.mulf %56, %60 : vector<64x8xf32>
    %62 = arith.addf %55, %61 : vector<64x8xf32>
    %c-2_i32 = arith.constant -2 : i32
    %63 = vector.broadcast %c-2_i32 : i32 to vector<64x8xi32>
    %64 = arith.addi %23, %63 : vector<64x8xi32>
    %c0_i32_30 = arith.constant 0 : i32
    %65 = vector.broadcast %c0_i32_30 : i32 to vector<64x8xi32>
    %66 = arith.cmpi sge, %64, %65 : vector<64x8xi32>
    %c-2_i32_31 = arith.constant -2 : i32
    %67 = vector.broadcast %c-2_i32_31 : i32 to vector<64x8xi32>
    %68 = arith.addi %23, %67 : vector<64x8xi32>
    %c8_i32_32 = arith.constant 8 : i32
    %69 = vector.broadcast %c8_i32_32 : i32 to vector<64x8xi32>
    %70 = arith.cmpi slt, %68, %69 : vector<64x8xi32>
    %71 = arith.andi %66, %70 : vector<64x8xi1>
    %cst_33 = arith.constant 0.000000e+00 : f32
    %72 = vector.broadcast %cst_33 : f32 to vector<64x8xf32>
    %73 = arith.select %71, %62, %72 : vector<64x8xi1>, vector<64x8xf32>
    %74 = arith.addf %28, %73 : vector<64x8xf32>
    %c1_34 = arith.constant 1 : index
    %c0_35 = arith.constant 0 : index
    %75 = vector.load %arg7[%c1_34, %c0_35] : memref<100x8xf32, #tpu.memory_space<vmem>>, vector<64x8xf32>
    %c0_36 = arith.constant 0 : index
    %c1_37 = arith.constant 1 : index
    %c0_38 = arith.constant 0 : index
    %76 = vector.load %arg4[%c0_36, %c1_37, %c0_38] : memref<1x25x8xf32, #tpu.memory_space<vmem>>, vector<1x1x8xf32>
    %77 = vector.shape_cast %76 : vector<1x1x8xf32> to vector<8xf32>
    %78 = vector.shape_cast %77 : vector<8xf32> to vector<1x8xf32>
    %79 = vector.broadcast %78 : vector<1x8xf32> to vector<64x8xf32>
    %80 = arith.mulf %75, %79 : vector<64x8xf32>
    %c9 = arith.constant 9 : index
    %c0_39 = arith.constant 0 : index
    %81 = vector.load %arg7[%c9, %c0_39] : memref<100x8xf32, #tpu.memory_space<vmem>>, vector<64x8xf32>
    %c0_40 = arith.constant 0 : index
    %c6 = arith.constant 6 : index
    %c0_41 = arith.constant 0 : index
    %82 = vector.load %arg4[%c0_40, %c6, %c0_41] : memref<1x25x8xf32, #tpu.memory_space<vmem>>, vector<1x1x8xf32>
    %83 = vector.shape_cast %82 : vector<1x1x8xf32> to vector<8xf32>
    %84 = vector.shape_cast %83 : vector<8xf32> to vector<1x8xf32>
    %85 = vector.broadcast %84 : vector<1x8xf32> to vector<64x8xf32>
    %86 = arith.mulf %81, %85 : vector<64x8xf32>
    %87 = arith.addf %80, %86 : vector<64x8xf32>
    %c17 = arith.constant 17 : index
    %c0_42 = arith.constant 0 : index
    %88 = vector.load %arg7[%c17, %c0_42] : memref<100x8xf32, #tpu.memory_space<vmem>>, vector<64x8xf32>
    %c0_43 = arith.constant 0 : index
    %c11 = arith.constant 11 : index
    %c0_44 = arith.constant 0 : index
    %89 = vector.load %arg4[%c0_43, %c11, %c0_44] : memref<1x25x8xf32, #tpu.memory_space<vmem>>, vector<1x1x8xf32>
    %90 = vector.shape_cast %89 : vector<1x1x8xf32> to vector<8xf32>
    %91 = vector.shape_cast %90 : vector<8xf32> to vector<1x8xf32>
    %92 = vector.broadcast %91 : vector<1x8xf32> to vector<64x8xf32>
    %93 = arith.mulf %88, %92 : vector<64x8xf32>
    %94 = arith.addf %87, %93 : vector<64x8xf32>
    %c25 = arith.constant 25 : index
    %c0_45 = arith.constant 0 : index
    %95 = vector.load %arg7[%c25, %c0_45] : memref<100x8xf32, #tpu.memory_space<vmem>>, vector<64x8xf32>
    %c0_46 = arith.constant 0 : index
    %c16_47 = arith.constant 16 : index
    %c0_48 = arith.constant 0 : index
    %96 = vector.load %arg4[%c0_46, %c16_47, %c0_48] : memref<1x25x8xf32, #tpu.memory_space<vmem>>, vector<1x1x8xf32>
    %97 = vector.shape_cast %96 : vector<1x1x8xf32> to vector<8xf32>
    %98 = vector.shape_cast %97 : vector<8xf32> to vector<1x8xf32>
    %99 = vector.broadcast %98 : vector<1x8xf32> to vector<64x8xf32>
    %100 = arith.mulf %95, %99 : vector<64x8xf32>
    %101 = arith.addf %94, %100 : vector<64x8xf32>
    %c33 = arith.constant 33 : index
    %c0_49 = arith.constant 0 : index
    %102 = vector.load %arg7[%c33, %c0_49] : memref<100x8xf32, #tpu.memory_space<vmem>>, vector<64x8xf32>
    %c0_50 = arith.constant 0 : index
    %c21 = arith.constant 21 : index
    %c0_51 = arith.constant 0 : index
    %103 = vector.load %arg4[%c0_50, %c21, %c0_51] : memref<1x25x8xf32, #tpu.memory_space<vmem>>, vector<1x1x8xf32>
    %104 = vector.shape_cast %103 : vector<1x1x8xf32> to vector<8xf32>
    %105 = vector.shape_cast %104 : vector<8xf32> to vector<1x8xf32>
    %106 = vector.broadcast %105 : vector<1x8xf32> to vector<64x8xf32>
    %107 = arith.mulf %102, %106 : vector<64x8xf32>
    %108 = arith.addf %101, %107 : vector<64x8xf32>
    %c-1_i32 = arith.constant -1 : i32
    %109 = vector.broadcast %c-1_i32 : i32 to vector<64x8xi32>
    %110 = arith.addi %23, %109 : vector<64x8xi32>
    %c0_i32_52 = arith.constant 0 : i32
    %111 = vector.broadcast %c0_i32_52 : i32 to vector<64x8xi32>
    %112 = arith.cmpi sge, %110, %111 : vector<64x8xi32>
    %c-1_i32_53 = arith.constant -1 : i32
    %113 = vector.broadcast %c-1_i32_53 : i32 to vector<64x8xi32>
    %114 = arith.addi %23, %113 : vector<64x8xi32>
    %c8_i32_54 = arith.constant 8 : i32
    %115 = vector.broadcast %c8_i32_54 : i32 to vector<64x8xi32>
    %116 = arith.cmpi slt, %114, %115 : vector<64x8xi32>
    %117 = arith.andi %112, %116 : vector<64x8xi1>
    %cst_55 = arith.constant 0.000000e+00 : f32
    %118 = vector.broadcast %cst_55 : f32 to vector<64x8xf32>
    %119 = arith.select %117, %108, %118 : vector<64x8xi1>, vector<64x8xf32>
    %120 = arith.addf %74, %119 : vector<64x8xf32>
    %c2 = arith.constant 2 : index
    %c0_56 = arith.constant 0 : index
    %121 = vector.load %arg7[%c2, %c0_56] : memref<100x8xf32, #tpu.memory_space<vmem>>, vector<64x8xf32>
    %c0_57 = arith.constant 0 : index
    %c2_58 = arith.constant 2 : index
    %c0_59 = arith.constant 0 : index
    %122 = vector.load %arg4[%c0_57, %c2_58, %c0_59] : memref<1x25x8xf32, #tpu.memory_space<vmem>>, vector<1x1x8xf32>
    %123 = vector.shape_cast %122 : vector<1x1x8xf32> to vector<8xf32>
    %124 = vector.shape_cast %123 : vector<8xf32> to vector<1x8xf32>
    %125 = vector.broadcast %124 : vector<1x8xf32> to vector<64x8xf32>
    %126 = arith.mulf %121, %125 : vector<64x8xf32>
    %c10_60 = arith.constant 10 : index
    %c0_61 = arith.constant 0 : index
    %127 = vector.load %arg7[%c10_60, %c0_61] : memref<100x8xf32, #tpu.memory_space<vmem>>, vector<64x8xf32>
    %c0_62 = arith.constant 0 : index
    %c7 = arith.constant 7 : index
    %c0_63 = arith.constant 0 : index
    %128 = vector.load %arg4[%c0_62, %c7, %c0_63] : memref<1x25x8xf32, #tpu.memory_space<vmem>>, vector<1x1x8xf32>
    %129 = vector.shape_cast %128 : vector<1x1x8xf32> to vector<8xf32>
    %130 = vector.shape_cast %129 : vector<8xf32> to vector<1x8xf32>
    %131 = vector.broadcast %130 : vector<1x8xf32> to vector<64x8xf32>
    %132 = arith.mulf %127, %131 : vector<64x8xf32>
    %133 = arith.addf %126, %132 : vector<64x8xf32>
    %c18_64 = arith.constant 18 : index
    %c0_65 = arith.constant 0 : index
    %134 = vector.load %arg7[%c18_64, %c0_65] : memref<100x8xf32, #tpu.memory_space<vmem>>, vector<64x8xf32>
    %c0_66 = arith.constant 0 : index
    %c12 = arith.constant 12 : index
    %c0_67 = arith.constant 0 : index
    %135 = vector.load %arg4[%c0_66, %c12, %c0_67] : memref<1x25x8xf32, #tpu.memory_space<vmem>>, vector<1x1x8xf32>
    %136 = vector.shape_cast %135 : vector<1x1x8xf32> to vector<8xf32>
    %137 = vector.shape_cast %136 : vector<8xf32> to vector<1x8xf32>
    %138 = vector.broadcast %137 : vector<1x8xf32> to vector<64x8xf32>
    %139 = arith.mulf %134, %138 : vector<64x8xf32>
    %140 = arith.addf %133, %139 : vector<64x8xf32>
    %c26 = arith.constant 26 : index
    %c0_68 = arith.constant 0 : index
    %141 = vector.load %arg7[%c26, %c0_68] : memref<100x8xf32, #tpu.memory_space<vmem>>, vector<64x8xf32>
    %c0_69 = arith.constant 0 : index
    %c17_70 = arith.constant 17 : index
    %c0_71 = arith.constant 0 : index
    %142 = vector.load %arg4[%c0_69, %c17_70, %c0_71] : memref<1x25x8xf32, #tpu.memory_space<vmem>>, vector<1x1x8xf32>
    %143 = vector.shape_cast %142 : vector<1x1x8xf32> to vector<8xf32>
    %144 = vector.shape_cast %143 : vector<8xf32> to vector<1x8xf32>
    %145 = vector.broadcast %144 : vector<1x8xf32> to vector<64x8xf32>
    %146 = arith.mulf %141, %145 : vector<64x8xf32>
    %147 = arith.addf %140, %146 : vector<64x8xf32>
    %c34 = arith.constant 34 : index
    %c0_72 = arith.constant 0 : index
    %148 = vector.load %arg7[%c34, %c0_72] : memref<100x8xf32, #tpu.memory_space<vmem>>, vector<64x8xf32>
    %c0_73 = arith.constant 0 : index
    %c22 = arith.constant 22 : index
    %c0_74 = arith.constant 0 : index
    %149 = vector.load %arg4[%c0_73, %c22, %c0_74] : memref<1x25x8xf32, #tpu.memory_space<vmem>>, vector<1x1x8xf32>
    %150 = vector.shape_cast %149 : vector<1x1x8xf32> to vector<8xf32>
    %151 = vector.shape_cast %150 : vector<8xf32> to vector<1x8xf32>
    %152 = vector.broadcast %151 : vector<1x8xf32> to vector<64x8xf32>
    %153 = arith.mulf %148, %152 : vector<64x8xf32>
    %154 = arith.addf %147, %153 : vector<64x8xf32>
    %155 = arith.addf %120, %154 : vector<64x8xf32>
    %c3 = arith.constant 3 : index
    %c0_75 = arith.constant 0 : index
    %156 = vector.load %arg7[%c3, %c0_75] : memref<100x8xf32, #tpu.memory_space<vmem>>, vector<64x8xf32>
    %c0_76 = arith.constant 0 : index
    %c3_77 = arith.constant 3 : index
    %c0_78 = arith.constant 0 : index
    %157 = vector.load %arg4[%c0_76, %c3_77, %c0_78] : memref<1x25x8xf32, #tpu.memory_space<vmem>>, vector<1x1x8xf32>
    %158 = vector.shape_cast %157 : vector<1x1x8xf32> to vector<8xf32>
    %159 = vector.shape_cast %158 : vector<8xf32> to vector<1x8xf32>
    %160 = vector.broadcast %159 : vector<1x8xf32> to vector<64x8xf32>
    %161 = arith.mulf %156, %160 : vector<64x8xf32>
    %c11_79 = arith.constant 11 : index
    %c0_80 = arith.constant 0 : index
    %162 = vector.load %arg7[%c11_79, %c0_80] : memref<100x8xf32, #tpu.memory_space<vmem>>, vector<64x8xf32>
    %c0_81 = arith.constant 0 : index
    %c8_82 = arith.constant 8 : index
    %c0_83 = arith.constant 0 : index
    %163 = vector.load %arg4[%c0_81, %c8_82, %c0_83] : memref<1x25x8xf32, #tpu.memory_space<vmem>>, vector<1x1x8xf32>
    %164 = vector.shape_cast %163 : vector<1x1x8xf32> to vector<8xf32>
    %165 = vector.shape_cast %164 : vector<8xf32> to vector<1x8xf32>
    %166 = vector.broadcast %165 : vector<1x8xf32> to vector<64x8xf32>
    %167 = arith.mulf %162, %166 : vector<64x8xf32>
    %168 = arith.addf %161, %167 : vector<64x8xf32>
    %c19 = arith.constant 19 : index
    %c0_84 = arith.constant 0 : index
    %169 = vector.load %arg7[%c19, %c0_84] : memref<100x8xf32, #tpu.memory_space<vmem>>, vector<64x8xf32>
    %c0_85 = arith.constant 0 : index
    %c13 = arith.constant 13 : index
    %c0_86 = arith.constant 0 : index
    %170 = vector.load %arg4[%c0_85, %c13, %c0_86] : memref<1x25x8xf32, #tpu.memory_space<vmem>>, vector<1x1x8xf32>
    %171 = vector.shape_cast %170 : vector<1x1x8xf32> to vector<8xf32>
    %172 = vector.shape_cast %171 : vector<8xf32> to vector<1x8xf32>
    %173 = vector.broadcast %172 : vector<1x8xf32> to vector<64x8xf32>
    %174 = arith.mulf %169, %173 : vector<64x8xf32>
    %175 = arith.addf %168, %174 : vector<64x8xf32>
    %c27 = arith.constant 27 : index
    %c0_87 = arith.constant 0 : index
    %176 = vector.load %arg7[%c27, %c0_87] : memref<100x8xf32, #tpu.memory_space<vmem>>, vector<64x8xf32>
    %c0_88 = arith.constant 0 : index
    %c18_89 = arith.constant 18 : index
    %c0_90 = arith.constant 0 : index
    %177 = vector.load %arg4[%c0_88, %c18_89, %c0_90] : memref<1x25x8xf32, #tpu.memory_space<vmem>>, vector<1x1x8xf32>
    %178 = vector.shape_cast %177 : vector<1x1x8xf32> to vector<8xf32>
    %179 = vector.shape_cast %178 : vector<8xf32> to vector<1x8xf32>
    %180 = vector.broadcast %179 : vector<1x8xf32> to vector<64x8xf32>
    %181 = arith.mulf %176, %180 : vector<64x8xf32>
    %182 = arith.addf %175, %181 : vector<64x8xf32>
    %c35 = arith.constant 35 : index
    %c0_91 = arith.constant 0 : index
    %183 = vector.load %arg7[%c35, %c0_91] : memref<100x8xf32, #tpu.memory_space<vmem>>, vector<64x8xf32>
    %c0_92 = arith.constant 0 : index
    %c23 = arith.constant 23 : index
    %c0_93 = arith.constant 0 : index
    %184 = vector.load %arg4[%c0_92, %c23, %c0_93] : memref<1x25x8xf32, #tpu.memory_space<vmem>>, vector<1x1x8xf32>
    %185 = vector.shape_cast %184 : vector<1x1x8xf32> to vector<8xf32>
    %186 = vector.shape_cast %185 : vector<8xf32> to vector<1x8xf32>
    %187 = vector.broadcast %186 : vector<1x8xf32> to vector<64x8xf32>
    %188 = arith.mulf %183, %187 : vector<64x8xf32>
    %189 = arith.addf %182, %188 : vector<64x8xf32>
    %c1_i32_94 = arith.constant 1 : i32
    %190 = vector.broadcast %c1_i32_94 : i32 to vector<64x8xi32>
    %191 = arith.addi %23, %190 : vector<64x8xi32>
    %c0_i32_95 = arith.constant 0 : i32
    %192 = vector.broadcast %c0_i32_95 : i32 to vector<64x8xi32>
    %193 = arith.cmpi sge, %191, %192 : vector<64x8xi32>
    %c1_i32_96 = arith.constant 1 : i32
    %194 = vector.broadcast %c1_i32_96 : i32 to vector<64x8xi32>
    %195 = arith.addi %23, %194 : vector<64x8xi32>
    %c8_i32_97 = arith.constant 8 : i32
    %196 = vector.broadcast %c8_i32_97 : i32 to vector<64x8xi32>
    %197 = arith.cmpi slt, %195, %196 : vector<64x8xi32>
    %198 = arith.andi %193, %197 : vector<64x8xi1>
    %cst_98 = arith.constant 0.000000e+00 : f32
    %199 = vector.broadcast %cst_98 : f32 to vector<64x8xf32>
    %200 = arith.select %198, %189, %199 : vector<64x8xi1>, vector<64x8xf32>
    %201 = arith.addf %155, %200 : vector<64x8xf32>
    %c4 = arith.constant 4 : index
    %c0_99 = arith.constant 0 : index
    %202 = vector.load %arg7[%c4, %c0_99] : memref<100x8xf32, #tpu.memory_space<vmem>>, vector<64x8xf32>
    %c0_100 = arith.constant 0 : index
    %c4_101 = arith.constant 4 : index
    %c0_102 = arith.constant 0 : index
    %203 = vector.load %arg4[%c0_100, %c4_101, %c0_102] : memref<1x25x8xf32, #tpu.memory_space<vmem>>, vector<1x1x8xf32>
    %204 = vector.shape_cast %203 : vector<1x1x8xf32> to vector<8xf32>
    %205 = vector.shape_cast %204 : vector<8xf32> to vector<1x8xf32>
    %206 = vector.broadcast %205 : vector<1x8xf32> to vector<64x8xf32>
    %207 = arith.mulf %202, %206 : vector<64x8xf32>
    %c12_103 = arith.constant 12 : index
    %c0_104 = arith.constant 0 : index
    %208 = vector.load %arg7[%c12_103, %c0_104] : memref<100x8xf32, #tpu.memory_space<vmem>>, vector<64x8xf32>
    %c0_105 = arith.constant 0 : index
    %c9_106 = arith.constant 9 : index
    %c0_107 = arith.constant 0 : index
    %209 = vector.load %arg4[%c0_105, %c9_106, %c0_107] : memref<1x25x8xf32, #tpu.memory_space<vmem>>, vector<1x1x8xf32>
    %210 = vector.shape_cast %209 : vector<1x1x8xf32> to vector<8xf32>
    %211 = vector.shape_cast %210 : vector<8xf32> to vector<1x8xf32>
    %212 = vector.broadcast %211 : vector<1x8xf32> to vector<64x8xf32>
    %213 = arith.mulf %208, %212 : vector<64x8xf32>
    %214 = arith.addf %207, %213 : vector<64x8xf32>
    %c20_108 = arith.constant 20 : index
    %c0_109 = arith.constant 0 : index
    %215 = vector.load %arg7[%c20_108, %c0_109] : memref<100x8xf32, #tpu.memory_space<vmem>>, vector<64x8xf32>
    %c0_110 = arith.constant 0 : index
    %c14 = arith.constant 14 : index
    %c0_111 = arith.constant 0 : index
    %216 = vector.load %arg4[%c0_110, %c14, %c0_111] : memref<1x25x8xf32, #tpu.memory_space<vmem>>, vector<1x1x8xf32>
    %217 = vector.shape_cast %216 : vector<1x1x8xf32> to vector<8xf32>
    %218 = vector.shape_cast %217 : vector<8xf32> to vector<1x8xf32>
    %219 = vector.broadcast %218 : vector<1x8xf32> to vector<64x8xf32>
    %220 = arith.mulf %215, %219 : vector<64x8xf32>
    %221 = arith.addf %214, %220 : vector<64x8xf32>
    %c28 = arith.constant 28 : index
    %c0_112 = arith.constant 0 : index
    %222 = vector.load %arg7[%c28, %c0_112] : memref<100x8xf32, #tpu.memory_space<vmem>>, vector<64x8xf32>
    %c0_113 = arith.constant 0 : index
    %c19_114 = arith.constant 19 : index
    %c0_115 = arith.constant 0 : index
    %223 = vector.load %arg4[%c0_113, %c19_114, %c0_115] : memref<1x25x8xf32, #tpu.memory_space<vmem>>, vector<1x1x8xf32>
    %224 = vector.shape_cast %223 : vector<1x1x8xf32> to vector<8xf32>
    %225 = vector.shape_cast %224 : vector<8xf32> to vector<1x8xf32>
    %226 = vector.broadcast %225 : vector<1x8xf32> to vector<64x8xf32>
    %227 = arith.mulf %222, %226 : vector<64x8xf32>
    %228 = arith.addf %221, %227 : vector<64x8xf32>
    %c36 = arith.constant 36 : index
    %c0_116 = arith.constant 0 : index
    %229 = vector.load %arg7[%c36, %c0_116] : memref<100x8xf32, #tpu.memory_space<vmem>>, vector<64x8xf32>
    %c0_117 = arith.constant 0 : index
    %c24_118 = arith.constant 24 : index
    %c0_119 = arith.constant 0 : index
    %230 = vector.load %arg4[%c0_117, %c24_118, %c0_119] : memref<1x25x8xf32, #tpu.memory_space<vmem>>, vector<1x1x8xf32>
    %231 = vector.shape_cast %230 : vector<1x1x8xf32> to vector<8xf32>
    %232 = vector.shape_cast %231 : vector<8xf32> to vector<1x8xf32>
    %233 = vector.broadcast %232 : vector<1x8xf32> to vector<64x8xf32>
    %234 = arith.mulf %229, %233 : vector<64x8xf32>
    %235 = arith.addf %228, %234 : vector<64x8xf32>
    %c2_i32 = arith.constant 2 : i32
    %236 = vector.broadcast %c2_i32 : i32 to vector<64x8xi32>
    %237 = arith.addi %23, %236 : vector<64x8xi32>
    %c0_i32_120 = arith.constant 0 : i32
    %238 = vector.broadcast %c0_i32_120 : i32 to vector<64x8xi32>
    %239 = arith.cmpi sge, %237, %238 : vector<64x8xi32>
    %c2_i32_121 = arith.constant 2 : i32
    %240 = vector.broadcast %c2_i32_121 : i32 to vector<64x8xi32>
    %241 = arith.addi %23, %240 : vector<64x8xi32>
    %c8_i32_122 = arith.constant 8 : i32
    %242 = vector.broadcast %c8_i32_122 : i32 to vector<64x8xi32>
    %243 = arith.cmpi slt, %241, %242 : vector<64x8xi32>
    %244 = arith.andi %239, %243 : vector<64x8xi1>
    %cst_123 = arith.constant 0.000000e+00 : f32
    %245 = vector.broadcast %cst_123 : f32 to vector<64x8xf32>
    %246 = arith.select %244, %235, %245 : vector<64x8xi1>, vector<64x8xf32>
    %247 = arith.addf %201, %246 : vector<64x8xf32>
    %c0_124 = arith.constant 0 : index
    %c0_125 = arith.constant 0 : index
    %c1_126 = arith.constant 1 : index
    %c0_127 = arith.constant 0 : index
    %248 = vector.load %arg2[%c0_124, %c0_125, %c1_126, %c0_127] : memref<1x1x65x8xf32, #tpu.memory_space<vmem>>, vector<1x1x64x8xf32>
    %249 = vector.shape_cast %248 : vector<1x1x64x8xf32> to vector<64x8xf32>
    %250 = arith.mulf %247, %249 : vector<64x8xf32>
    %cst_128 = arith.constant 0.000000e+00 : f32
    %251 = vector.broadcast %cst_128 : f32 to vector<1x8xf32>
    %c0_129 = arith.constant 0 : index
    %c0_130 = arith.constant 0 : index
    %c0_131 = arith.constant 0 : index
    %c0_132 = arith.constant 0 : index
    %252 = vector.load %arg6[%c0_129, %c0_130, %c0_131, %c0_132] : memref<1x1x65x8xf32, #tpu.memory_space<vmem>>, vector<1x1x1x8xf32>
    %253 = vector.shape_cast %252 : vector<1x1x1x8xf32> to vector<1x8xf32>
    %254 = vector.shape_cast %251 : vector<1x8xf32> to vector<1x1x1x8xf32>
    tpu.vector_store %arg6[%c0_129, %c0_130, %c0_131, %c0_132], %254 {strides = array<i32>} : memref<1x1x65x8xf32, #tpu.memory_space<vmem>>, vector<1x1x1x8xf32>,
    %c0_133 = arith.constant 0 : index
    %c0_134 = arith.constant 0 : index
    %c1_135 = arith.constant 1 : index
    %c0_136 = arith.constant 0 : index
    %255 = vector.load %arg6[%c0_133, %c0_134, %c1_135, %c0_136] : memref<1x1x65x8xf32, #tpu.memory_space<vmem>>, vector<1x1x64x8xf32>
    %256 = vector.shape_cast %255 : vector<1x1x64x8xf32> to vector<64x8xf32>
    %257 = vector.shape_cast %250 : vector<64x8xf32> to vector<1x1x64x8xf32>
    tpu.vector_store %arg6[%c0_133, %c0_134, %c1_135, %c0_136], %257 {strides = array<i32>} : memref<1x1x65x8xf32, #tpu.memory_space<vmem>>, vector<1x1x64x8xf32>,
    return
  }
  func.func @transform_0(%arg0: i32, %arg1: i32) -> (i32, i32, i32, i32) {
    %c0_i32 = arith.constant 0 : i32
    %c0_i32_0 = arith.constant 0 : i32
    %c0_i32_1 = arith.constant 0 : i32
    return %arg0, %arg1, %c0_i32, %c0_i32_0 : i32, i32, i32, i32
  }
  func.func @transform_1(%arg0: i32, %arg1: i32) -> (i32, i32, i32, i32) {
    %c0_i32 = arith.constant 0 : i32
    %c0_i32_0 = arith.constant 0 : i32
    %c0_i32_1 = arith.constant 0 : i32
    return %arg0, %arg1, %c0_i32, %c0_i32_0 : i32, i32, i32, i32
  }
  func.func @transform_2(%arg0: i32, %arg1: i32) -> (i32, i32, i32) {
    %c0_i32 = arith.constant 0 : i32
    %c0_i32_0 = arith.constant 0 : i32
    %c0_i32_1 = arith.constant 0 : i32
    return %arg1, %c0_i32, %c0_i32_0 : i32, i32, i32
  }
  func.func @transform_3(%arg0: i32, %arg1: i32) -> (i32, i32, i32) {
    %c0_i32 = arith.constant 0 : i32
    %c0_i32_0 = arith.constant 0 : i32
    %c0_i32_1 = arith.constant 0 : i32
    return %arg1, %c0_i32, %c0_i32_0 : i32, i32, i32
  }
  func.func @transform_4(%arg0: i32, %arg1: i32) -> (i32, i32, i32, i32) {
    %c0_i32 = arith.constant 0 : i32
    %c0_i32_0 = arith.constant 0 : i32
    %c0_i32_1 = arith.constant 0 : i32
    return %arg0, %arg1, %c0_i32, %c0_i32_0 : i32, i32, i32, i32
  }
}

</mosaic_0001>

<bundles_post_ra>
// kernel: tpu_custom_call.1
= control target key start
LH: loop header
LB: loop body
LE: loop exit
PB: predicated region body
PF: predicated region fallthrough
CT: control target
= control target key end

     0   :  { %s1511_s15 = smov 0   ;;  %s1513_s16 = smov 0   ;;  %s2315_s0 = inlined_call_operand.vmem [shape: f32[2,3,65,8], index: 0, kind: input, shape index: {}]   ;;  %s2316_s1 = inlined_call_operand.vmem [shape: f32[2,3,65,8], index: 1, kind: input, shape index: {}]   ;;  %s2317_s2 = inlined_call_operand.vmem [shape: f32[3,25,8], index: 2, kind: input, shape index: {}]   ;;  %s2318_s3 = inlined_call_operand.vmem [shape: f32[3,1,8], index: 3, kind: input, shape index: {}]   ;;  %s2319_s4 = inlined_call_operand.vmem [shape: f32[2,3,65,8], index: 4, kind: output, shape index: {}]  }
   0x1   :  { %s1515_s17 = smov 0   ;;  %s1517_s18 = smov 0  }
   0x2   :  { %s1519_s19 = smov 0  }
   0x3 LB: > { %s23_s20 = sadd.s32 1, %s1475_s17  ;;  %s26_s21 = sadd.s32 1, %s1479_s18  ;;  %s1483_s19 = sphi %s1519_s19, %s14_s19   ;;  %s1479_s18 = sphi %s1517_s18, %s2443_s18   ;;  %s1475_s17 = sphi %s1515_s17, %s2442_s17   ;;  %s1471_s16 = sphi %s1513_s16, %s2441_s16   ;;  %s1467_s15 = sphi %s1511_s15, %s2440_s15  }
   0x4   : > { %p24_p0 = scmp.ge.s32.totalorder %s23_s20, 3  ;;  %p1350_p1 = scmp.ge.s32.totalorder %s1483_s19, 1 }
   0x5   : > { %p216_p2 = scmp.lt.s32.totalorder %s1483_s19, 7 }
   0x6   : > { %s2445_s20 = smov (%p24_p0, %s23_s20), 0  ;;  %s2447_s21 = smov (!%p24_p0, %s26_s21), %s1479_s18 }
   0x7   : > { %p217_p3 = pnand %p1350_p1, %p216_p2  ;;  %p28_p4 = scmp.ge.s32.totalorder %s2447_s21, 2 }
   0x9   : > { %s2449_s21 = smov (%p28_p4, %s2447_s21), 0  ;;  %220 = sbr.rel (%p217_p3) target bundleno = 166 (0xa6), region = 36 }
   0xe   : > { %vm302_vm0 = vcmask 64512   ;;  %vm305_vm1 = vcmask 58368   ;;  %p267_p5 = scmp.lt.s32.totalorder %s1471_s16, 1  ;;  %p269_p6 = scmp.lt.s32.totalorder %s1467_s15, 2  ;;  %v326_v0 = vlaneseq  ;;  %v1485_v1 = vmov 0.0  }
   0xf   : > { %303 = vst.msk [vmem:[#allocation2] sm:$0xff] %vm302_vm0, %v1485_v1  ;;  %304 = vst.msk [vmem:[#allocation2 + $0x8] sm:$0xff] %vm302_vm0, %v1485_v1  ;;  %vm1199_vm2 = vcmask 57344  }
  0x10   : > { %307 = vst.msk [vmem:[#allocation2 + $0x52] sm:$0xff] %vm302_vm0, %v1485_v1  ;;  %308 = vst.msk [vmem:[#allocation2 + $0x5a] sm:$0xff] %vm302_vm0, %v1485_v1  ;;  %s2451_s16 = smov (!%p267_p5, %s1471_s16), 1  ;;  %v327_v2 = vshrl.u32 %v326_v0, 7  ;;  %s2453_s15 = smov (!%p269_p6, %s1467_s15), 2 }
  0x11   : > { %306 = vst.msk [vmem:[#allocation2 + $0x10] sm:$0x3] %vm305_vm1, %v1485_v1  ;;  %309 = vst.msk [vmem:[#allocation2 + $0x62] sm:$0x3] %vm305_vm1, %v1485_v1  ;;  %s1386_s22 = smul.u32 27, %s2451_s16  ;;  %s1384_s24 = sshll.u32 %s2453_s15, 5 }
  0x12   : > { %s1385_s23 = smul.u32 9, %s2453_s15  ;;  %s1556_s27 = scalar_lea.vmem %s2317_s2, %s1384_s24  ;;  %v328_v3 = vadd.s32 8, %v327_v2  ;;  %v339_v4 = vand.u32 7, %v327_v2  ;;  %v329_v10 = vadd.s32 16, %v327_v2  ;;  %v330_v11 = vadd.s32 24, %v327_v2 }
  0x13   : > { %v1561_v5 = vld [vmem:[%s1556_s27] ss:$0 sm:$0xff]  ;;  %v1564_v6 = vld [vmem:[%s1556_s27 + $0x5] ss:$0 sm:$0xff]  ;;  %v331_v16 = vadd.s32 32, %v327_v2  ;;  %v1578_v17 = vadd.s32 40, %v327_v2  ;;  %s292_s12 = scalar_lea.vmem %s2318_s3, %s2453_s15 }
  0x14   : > { %s273_s28 = sadd.s32 %s1386_s22, %s1385_s23  ;;  %2367 = vst [vmem:[#allocation3_spill] sm:$0xff] %v1561_v5  ;;  %2368 = vst [vmem:[#allocation4_spill] sm:$0xff] %v1564_v6  ;;  %v1576_v15 = vand.u32 7, %v328_v3  ;;  %v1583_v21 = vadd.s32 4294967294, %v339_v4  ;;  %v1587_v22 = vadd.s32 48, %v327_v2  ;;  %v1589_v23 = vadd.s32 56, %v327_v2 }
  0x15   : > { %s1558_s29 = sshll.u32 %s273_s28, 3  ;;  %2369 = vst [vmem:[#allocation5_spill] sm:$0xff] %v1578_v17  ;;  %v1594_v27 = vadd.s32 4294967295, %v339_v4  ;;  %v1596_v28 = vadd.s32 1, %v339_v4  ;;  %v1598_v29 = vadd.s32 2, %v339_v4  ;;  %v1610_v34 = vand.u32 7, %v329_v10 }
  0x16   : > { %s284_s6 = scalar_lea.vmem %s2316_s1, %s1558_s29  ;;  %v438_v7 = vld [vmem:[#allocation2] sm:$0xff]  ;;  %v439_v8 = vld [vmem:[#allocation2 + $0x8] sm:$0xff]  ;;  %s1574_s9 = scalar_lea.vmem %s2319_s4, %s1558_s29  ;;  %2370 = vst [vmem:[#allocation6_spill] sm:$0xff] %v1587_v22  ;;  %2371 = vst [vmem:[#allocation7_spill] sm:$0xff] %v1589_v23  ;;  %v1612_v35 = vand.u32 7, %v330_v11  ;;  %v1623_v41 = vadd.s32 4294967294, %v1576_v15 }
  0x17   : > { %v595_v9 = vld [vmem:[#allocation2 + $0x1] sm:$0xff]  ;;  %v311_v13 = vld [vmem:[%s284_s6 + $0x9] sm:$0xff]  ;;  %v312_v14 = vld [vmem:[%s284_s6 + $0x11] sm:$0xff]  ;;  %1200 = vst.msk [vmem:[%s1574_s9] sm:$0x1] %vm1199_vm2, %v1485_v1  ;;  %v451_v30 = vmul.f32 %v1561_v5, %v438_v7  ;;  %v465_v31 = vmul.f32 %v1564_v6, %v439_v8  ;;  %v1625_v42 = vand.u32 7, %v331_v16  ;;  %v452_v55 = vmul.f32 %v1561_v5, %v439_v8  ;;  %s1821_s15 = scalar_lea.vmem %s2315_s0, %s1558_s29 }
  0x18   : > { %v310_v12 = vld [vmem:[%s284_s6 + $0x1] sm:$0xff]  ;;  %319 = vst.msk [vmem:[#allocation2 + $0x1a] sm:$0xff] %vm302_vm0, %v311_v13  ;;  %320 = vst.msk [vmem:[#allocation2 + $0x22] sm:$0xff] %vm302_vm0, %v312_v14  ;;  %v313_v18 = vld [vmem:[%s284_s6 + $0x19] sm:$0xff]  ;;  %v1643_v49 = vadd.s32 4294967295, %v1576_v15  ;;  %vm555_vm3 = vcmp.ge.s32.totalorder %v1583_v21, 0 }
  0x19   : > { %318 = vst.msk [vmem:[#allocation2 + $0x12] sm:$0xff] %vm302_vm0, %v310_v12  ;;  %v314_v19 = vld [vmem:[%s284_s6 + $0x21] sm:$0xff]  ;;  %v315_v20 = vld [vmem:[%s284_s6 + $0x29] sm:$0xff]  ;;  %321 = vst.msk [vmem:[#allocation2 + $0x2a] sm:$0xff] %vm302_vm0, %v313_v18  ;;  %v473_v56 = vadd.f32 %v465_v31, %v451_v30  ;;  %v1671_v63 = vadd.s32 1, %v1576_v15  ;;  %vm712_vm4 = vcmp.ge.s32.totalorder %v1594_v27, 0 }
  0x1a   : > { %322 = vst.msk [vmem:[#allocation2 + $0x32] sm:$0xff] %vm302_vm0, %v314_v19  ;;  %323 = vst.msk [vmem:[#allocation2 + $0x3a] sm:$0xff] %vm302_vm0, %v315_v20  ;;  %v316_v24 = vld [vmem:[%s284_s6 + $0x31] sm:$0xff]  ;;  %v317_v25 = vld [vmem:[%s284_s6 + $0x39] sm:$0xff]  ;;  %v1685_v8 = vadd.s32 2, %v1576_v15  ;;  %v1700_v16 = vadd.s32 4294967294, %v1610_v34 }
  0x1b   : > { %v596_v26 = vld [vmem:[#allocation2 + $0x9] sm:$0xff]  ;;  %324 = vst.msk [vmem:[#allocation2 + $0x42] sm:$0xff] %vm302_vm0, %v316_v24  ;;  %325 = vst.msk [vmem:[#allocation2 + $0x4a] sm:$0xff] %vm302_vm0, %v317_v25  ;;  %v1605_v32 = vld [vmem:[%s1556_s27 + $0x1] ss:$0 sm:$0xff]  ;;  %vm994_vm5 = vcmp.lt.s32.totalorder %v1596_v28, 8 }
  0x1c   : > { %2372 = vst [vmem:[#allocation8_spill] sm:$0xff] %v1605_v32  ;;  %v1608_v33 = vld [vmem:[%s1556_s27 + $0x6] ss:$0 sm:$0xff]  ;;  %2374 = vst [vmem:[#allocation10_spill] sm:$0xff] %v1610_v34  ;;  %v1615_v36 = vld [vmem:[%s1556_s27 + $0xa] ss:$0 sm:$0xff]  ;;  %v608_v38 = vmul.f32 %v1605_v32, %v595_v9  ;;  %v1668_v62 = vmul.f32 %v1605_v32, %v596_v26 }
  0x1d   : > { %2373 = vst [vmem:[#allocation9_spill] sm:$0xff] %v1608_v33  ;;  %2375 = vst [vmem:[#allocation11_spill] sm:$0xff] %v1612_v35  ;;  %v1618_v37 = vld [vmem:[%s1556_s27 + $0xf] ss:$0 sm:$0xff]  ;;  %v622_v39 = vmul.f32 %v1608_v33, %v596_v26  ;;  %v752_v40 = vld [vmem:[#allocation2 + $0x2] sm:$0xff]  ;;  %vm556_vm6 = vcmp.ge.s32.totalorder %v1623_v41, 0 }
  0x1e   : > { %2376 = vst [vmem:[#allocation12_spill] sm:$0xff] %v1615_v36  ;;  %2377 = vst [vmem:[#allocation13_spill] sm:$0xff] %v1618_v37  ;;  %v1628_v43 = vld [vmem:[%s1556_s27 + $0x14] ss:$0 sm:$0xff]  ;;  %v1631_v44 = vld [vmem:[%s1556_s27 + $0xb] ss:$0 sm:$0xff] }
  0x1f   : > { %2378 = vst [vmem:[#allocation14_spill] sm:$0xff] %v1625_v42  ;;  %2379 = vst [vmem:[#allocation15_spill] sm:$0xff] %v1628_v43  ;;  %v1634_v45 = vld [vmem:[%s1556_s27 + $0x10] ss:$0 sm:$0xff]  ;;  %v1637_v47 = vld [vmem:[%s1556_s27 + $0x2] ss:$0 sm:$0xff]  ;;  %v630_v57 = vadd.f32 %v622_v39, %v608_v38 }
  0x20   : > { %2380 = vst [vmem:[#allocation16_spill] sm:$0xff] %v1631_v44  ;;  %2381 = vst [vmem:[#allocation17_spill] sm:$0xff] %v1634_v45  ;;  %v753_v46 = vld [vmem:[#allocation2 + $0xa] sm:$0xff]  ;;  %v1640_v48 = vld [vmem:[%s1556_s27 + $0x7] ss:$0 sm:$0xff]  ;;  %v765_v51 = vmul.f32 %v1637_v47, %v752_v40  ;;  %vm1151_vm7 = vcmp.lt.s32.totalorder %v1598_v29, 8 }
  0x21   : > { %2382 = vst [vmem:[#allocation18_spill] sm:$0xff] %v1637_v47  ;;  %v1647_v50 = vld [vmem:[%s1556_s27 + $0x15] ss:$0 sm:$0xff]  ;;  %v779_v52 = vmul.f32 %v1640_v48, %v753_v46  ;;  %v1652_v53 = vld [vmem:[%s1556_s27 + $0xc] ss:$0 sm:$0xff]  ;;  %v869_v59 = vld [vmem:[#allocation2 + $0x3] sm:$0xff]  ;;  %v1682_v7 = vmul.f32 %v1637_v47, %v753_v46 }
  0x22   : > { %2383 = vst [vmem:[#allocation19_spill] sm:$0xff] %v1647_v50  ;;  %v1655_v54 = vld [vmem:[%s1556_s27 + $0x11] ss:$0 sm:$0xff]  ;;  %v1659_v58 = vld [vmem:[%s1556_s27 + $0x16] ss:$0 sm:$0xff]  ;;  %v1675_v1 = vld [vmem:[#allocation2 + $0x18] sm:$0xff] }
  0x23   : > { %v1662_v60 = vld [vmem:[%s1556_s27 + $0x3] ss:$0 sm:$0xff]  ;;  %v1665_v61 = vld [vmem:[%s1556_s27 + $0x8] ss:$0 sm:$0xff]  ;;  %v1673_v0 = vld [vmem:[#allocation2 + $0x10] sm:$0xff]  ;;  %2384 = vst [vmem:[#allocation20_spill] sm:$0xff] %v1675_v1  ;;  %v787_v3 = vadd.f32 %v779_v52, %v765_v51  ;;  %v509_v10 = vmul.f32 %v1618_v37, %v1675_v1  ;;  %v488_v51 = vmul.f32 %v1615_v36, %v1675_v1 }
  0x24   : > { %v1677_v2 = vld [vmem:[#allocation2 + $0x20] sm:$0xff]  ;;  %v882_v4 = vmul.f32 %v1662_v60, %v869_v59  ;;  %2386 = vst [vmem:[#allocation22_spill] sm:$0xff] %v1685_v8  ;;  %v487_v9 = vmul.f32 %v1615_v36, %v1673_v0  ;;  %v1691_v11 = vld [vmem:[#allocation2 + $0x11] sm:$0xff]  ;;  %v466_v14 = vmul.f32 %v1564_v6, %v1673_v0  ;;  %2390 = vst [vmem:[#allocation26_spill] sm:$0xff] %v1700_v16  ;;  %vm713_vm8 = vcmp.ge.s32.totalorder %v1643_v49, 0 }
  0x25   : > { %2385 = vst [vmem:[#allocation21_spill] sm:$0xff] %v1677_v2  ;;  %2387 = vst [vmem:[#allocation23_spill] sm:$0xff] %v1691_v11  ;;  %v1693_v12 = vld [vmem:[#allocation2 + $0x19] sm:$0xff]  ;;  %v1695_v13 = vld [vmem:[#allocation2 + $0x21] sm:$0xff]  ;;  %v531_v15 = vmul.f32 %v1628_v43, %v1677_v2  ;;  %v644_v18 = vmul.f32 %v1631_v44, %v1691_v11  ;;  %v510_v16 = vmul.f32 %v1618_v37, %v1677_v2  ;;  %vm995_vm9 = vcmp.lt.s32.totalorder %v1671_v63, 8 }
  0x26   : > { %2388 = vst [vmem:[#allocation24_spill] sm:$0xff] %v1693_v12  ;;  %2389 = vst [vmem:[#allocation25_spill] sm:$0xff] %v1695_v13  ;;  %v666_v19 = vmul.f32 %v1634_v45, %v1693_v12  ;;  %v688_v20 = vmul.f32 %v1647_v50, %v1695_v13  ;;  %v1710_v24 = vld [vmem:[#allocation2 + $0x12] sm:$0xff]  ;;  %v1712_v25 = vld [vmem:[#allocation2 + $0x1a] sm:$0xff]  ;;  %v495_v30 = vadd.f32 %v487_v9, %v473_v56 }
  0x27   : > { %v1714_v26 = vld [vmem:[#allocation2 + $0x22] sm:$0xff]  ;;  %v801_v31 = vmul.f32 %v1652_v53, %v1710_v24  ;;  %v823_v38 = vmul.f32 %v1655_v54, %v1712_v25  ;;  %v1724_v39 = vld [vmem:[#allocation2 + $0xb] sm:$0xff]  ;;  %v1726_v40 = vld [vmem:[#allocation2 + $0x13] sm:$0xff]  ;;  %v652_v52 = vadd.f32 %v644_v18, %v630_v57  ;;  %v474_v17 = vadd.f32 %v466_v14, %v452_v55 }
  0x28   : > { %v1728_v46 = vld [vmem:[#allocation2 + $0x1b] sm:$0xff]  ;;  %v845_v56 = vmul.f32 %v1659_v58, %v1714_v26  ;;  %v1735_v59 = vld [vmem:[#allocation2 + $0x23] sm:$0xff]  ;;  %v896_v9 = vmul.f32 %v1665_v61, %v1724_v39  ;;  %v1740_v23 = vld [vmem:[%s1556_s27 + $0xd] ss:$0 sm:$0xff]  ;;  %v517_v42 = vadd.f32 %v509_v10, %v495_v30  ;;  %v667_v27 = vmul.f32 %v1634_v45, %v1695_v13 }
  0x29   : > { %v1743_v22 = vld [vmem:[%s1556_s27 + $0x12] ss:$0 sm:$0xff]  ;;  %v809_v35 = vadd.f32 %v801_v31, %v787_v3  ;;  %v918_v57 = vmul.f32 %v1740_v23, %v1726_v40  ;;  %v1749_v18 = vld [vmem:[%s1556_s27 + $0x17] ss:$0 sm:$0xff]  ;;  %v1026_v47 = vld [vmem:[#allocation2 + $0x4] sm:$0xff]  ;;  %v674_v55 = vadd.f32 %v666_v19, %v652_v52  ;;  %v623_v52 = vmul.f32 %v1608_v33, %v1691_v11 }
  0x2a   : > { %v1751_v34 = vld [vmem:[#allocation2 + $0xc] sm:$0xff]  ;;  %v1755_v32 = vld [vmem:[%s292_s12] ss:$0 sm:$0xff]  ;;  %v904_v14 = vadd.f32 %v896_v9, %v882_v4  ;;  %v940_v3 = vmul.f32 %v1743_v22, %v1728_v46  ;;  %v962_v10 = vmul.f32 %v1749_v18, %v1735_v59  ;;  %v1761_v30 = vld [vmem:[#allocation2 + $0x14] sm:$0xff]  ;;  %v539_v36 = vadd.f32 %v531_v15, %v517_v42 }
  0x2b   : > { %v1763_v31 = vld [vmem:[#allocation2 + $0x1c] sm:$0xff]  ;;  %v831_v6 = vadd.f32 %v823_v38, %v809_v35  ;;  %v1766_v1 = vld [vmem:[%s1556_s27 + $0x4] ss:$0 sm:$0xff]  ;;  %v1769_v37 = vld [vmem:[%s1556_s27 + $0x9] ss:$0 sm:$0xff]  ;;  %v496_v4 = vadd.f32 %v488_v51, %v474_v17  ;;  %v696_v9 = vadd.f32 %v688_v20, %v674_v55  ;;  %v631_v11 = vadd.f32 %v623_v52, %v1668_v62 }
  0x2c   : > { %v1772_v19 = vld [vmem:[%s1556_s27 + $0xe] ss:$0 sm:$0xff]  ;;  %v926_v2 = vadd.f32 %v918_v57, %v904_v14  ;;  %v1039_v8 = vmul.f32 %v1766_v1, %v1026_v47  ;;  %v1053_v35 = vmul.f32 %v1769_v37, %v1751_v34  ;;  %v1781_v42 = vld [vmem:[%s1556_s27 + $0x13] ss:$0 sm:$0xff]  ;;  %v579_v15 = vsel %vm555_vm3, %v539_v36, 0.0  ;;  %v1786_v5 = vld [vmem:[#allocation2 + $0x24] sm:$0xff] }
  0x2d   : > { %2391 = vst [vmem:[#allocation27_spill] sm:$0xff] %v1772_v19  ;;  %v853_v38 = vadd.f32 %v845_v56, %v831_v6  ;;  %v1075_v17 = vmul.f32 %v1772_v19, %v1761_v30  ;;  %v1791_v20 = vld [vmem:[%s1556_s27 + $0x18] ss:$0 sm:$0xff]  ;;  %v1793_v51 = vld [vmem:[#allocation2 + $0x28] sm:$0xff]  ;;  %v645_v47 = vmul.f32 %v1631_v44, %v1693_v12  ;;  %v587_v57 = vadd.f32 %v1755_v32, %v579_v15 }
  0x2e   : > { %2392 = vst [vmem:[#allocation28_spill] sm:$0xff] %v1791_v20  ;;  %v948_v55 = vadd.f32 %v940_v3, %v926_v2  ;;  %v1061_v14 = vadd.f32 %v1053_v35, %v1039_v8  ;;  %v1097_v21 = vmul.f32 %v1781_v42, %v1763_v31  ;;  %v736_v6 = vsel %vm712_vm4, %v696_v9, 0.0  ;;  %v1804_v33 = vld [vmem:[#allocation2 + $0x29] sm:$0xff]  ;;  %v1900_v63 = vld [vmem:[#allocation2 + $0x32] sm:$0xff] }
  0x2f   : > { %v518_v36 = vadd.f32 %v510_v16, %v496_v4  ;;  %v532_v56 = vmul.f32 %v1628_v43, %v1793_v51  ;;  %v744_v44 = vadd.f32 %v736_v6, %v587_v57  ;;  %v1119_v2 = vmul.f32 %v1791_v20, %v1786_v5  ;;  %v1825_v52 = vld [vmem:[#allocation2 + $0x2a] sm:$0xff]  ;;  %v1183_v6 = vld [vmem:[%s1821_s15 + $0x1] sm:$0xff] }
  0x30   : > { %v970_v12 = vadd.f32 %v962_v10, %v948_v55  ;;  %v1083_v15 = vadd.f32 %v1075_v17, %v1061_v14  ;;  %v653_v3 = vadd.f32 %v645_v47, %v631_v11  ;;  %v780_v16 = vmul.f32 %v1640_v48, %v1710_v24  ;;  %v1834_v55 = vld [vmem:[#allocation2 + $0x2b] sm:$0xff] }
  0x31   : > { %v540_v8 = vadd.f32 %v532_v56, %v518_v36  ;;  %v861_v4 = vadd.f32 %v853_v38, %v744_v44  ;;  %v689_v62 = vmul.f32 %v1647_v50, %v1804_v33  ;;  %v802_v28 = vmul.f32 %v1652_v53, %v1712_v25 }
  0x32   : > { %v1010_v9 = vsel %vm994_vm5, %v970_v12, 0.0  ;;  %v1105_v35 = vadd.f32 %v1097_v21, %v1083_v15  ;;  %v675_v10 = vadd.f32 %v667_v27, %v653_v3  ;;  %v788_v44 = vadd.f32 %v780_v16, %v1682_v7  ;;  %v1851_v27 = vld [vmem:[#allocation2 + $0x2c] sm:$0xff] }
  0x33   : > { %v580_v11 = vsel %vm556_vm6, %v540_v8, 0.0  ;;  %v1018_v12 = vadd.f32 %v1010_v9, %v861_v4  ;;  %v824_v47 = vmul.f32 %v1655_v54, %v1714_v26  ;;  %v883_v14 = vmul.f32 %v1662_v60, %v1724_v39 }
  0x34   : > { %v1127_v38 = vadd.f32 %v1119_v2, %v1105_v35  ;;  %v588_v17 = vadd.f32 %v1755_v32, %v580_v11  ;;  %v697_v41 = vadd.f32 %v689_v62, %v675_v10  ;;  %v810_v57 = vadd.f32 %v802_v28, %v788_v44  ;;  %v1861_v10 = vld [vmem:[#allocation2 + $0x30] sm:$0xff] }
  0x35   : > { %v897_v7 = vmul.f32 %v1665_v61, %v1726_v40  ;;  %v846_v36 = vmul.f32 %v1659_v58, %v1825_v52  ;;  %v919_v56 = vmul.f32 %v1740_v23, %v1728_v46  ;;  %v941_v15 = vmul.f32 %v1743_v22, %v1735_v59 }
  0x36   : > { %v1167_v21 = vsel %vm1151_vm7, %v1127_v38, 0.0  ;;  %v737_v39 = vsel %vm713_vm8, %v697_v41, 0.0  ;;  %v832_v8 = vadd.f32 %v824_v47, %v810_v57  ;;  %v963_v16 = vmul.f32 %v1749_v18, %v1834_v55  ;;  %v2394_v41 = vld [vmem:[#allocation22_spill] sm:$0xff]  ;;  %v2395_v57 = vld [vmem:[#allocation20_spill] sm:$0xff] }
  0x37   : > { %v1175_v2 = vadd.f32 %v1167_v21, %v1018_v12  ;;  %v905_v3 = vadd.f32 %v897_v7, %v883_v14  ;;  %v745_v29 = vadd.f32 %v737_v39, %v588_v17  ;;  %v1040_v4 = vmul.f32 %v1766_v1, %v1751_v34  ;;  %v2393_v34 = vld [vmem:[#allocation3_spill] sm:$0xff]  ;;  %v2396_v14 = vld [vmem:[#allocation4_spill] sm:$0xff] }
  0x38   : > { %v1054_v9 = vmul.f32 %v1769_v37, %v1761_v30  ;;  %v854_v62 = vadd.f32 %v846_v36, %v832_v8  ;;  %v1076_v49 = vmul.f32 %v1772_v19, %v1763_v31  ;;  %v1098_v28 = vmul.f32 %v1781_v42, %v1786_v5  ;;  %v2398_v36 = vld [vmem:[#allocation12_spill] sm:$0xff] }
  0x39   : > { %v1191_v35 = vmul.f32 %v1183_v6, %v1175_v2  ;;  %v927_v11 = vadd.f32 %v919_v56, %v905_v3  ;;  %v1120_v12 = vmul.f32 %v1791_v20, %v1851_v27  ;;  %v453_v38 = vmul.f32 %v2393_v34, %v1673_v0  ;;  %v2397_v6 = vld [vmem:[#allocation21_spill] sm:$0xff] }
  0x3a   : > { %v1062_v44 = vadd.f32 %v1054_v9, %v1040_v4  ;;  %v862_v17 = vadd.f32 %v854_v62, %v745_v29  ;;  %vm1152_vm10 = vcmp.lt.s32.totalorder %v2394_v41, 8  ;;  %v467_v7 = vmul.f32 %v2396_v14, %v2395_v57  ;;  %v2399_v2 = vld [vmem:[#allocation13_spill] sm:$0xff]  ;;  %v2400_v4 = vld [vmem:[#allocation23_spill] sm:$0xff]  ;;  %v2401_v29 = vld [vmem:[#allocation8_spill] sm:$0xff] }
  0x3b   : > { %1201 = vst.msk [vmem:[%s1574_s9 + $0x1] sm:$0xff] %vm302_vm0, %v1191_v35  ;;  %v949_v47 = vadd.f32 %v941_v15, %v927_v11  ;;  %v489_v56 = vmul.f32 %v2398_v36, %v2397_v6  ;;  %v511_v39 = vmul.f32 %v2399_v2, %v1793_v51  ;;  %v533_v8 = vmul.f32 %v1628_v43, %v1861_v10  ;;  %v2402_v9 = vld [vmem:[#allocation24_spill] sm:$0xff]  ;;  %v2403_v35 = vld [vmem:[#allocation9_spill] sm:$0xff]  ;;  %v2404_v14 = vld [vmem:[#allocation26_spill] sm:$0xff] }
  0x3c   : > { %v1084_v21 = vadd.f32 %v1076_v49, %v1062_v44  ;;  %v475_v3 = vadd.f32 %v467_v7, %v453_v38  ;;  %v610_v15 = vmul.f32 %v2401_v29, %v2400_v4  ;;  %v624_v62 = vmul.f32 %v2403_v35, %v2402_v9  ;;  %v1885_v49 = vld [vmem:[#allocation2 + $0x31] sm:$0xff]  ;;  %v2406_v7 = vld [vmem:[#allocation10_spill] sm:$0xff] }
  0x3d   : > { %v971_v0 = vadd.f32 %v963_v16, %v949_v47  ;;  %vm557_vm11 = vcmp.ge.s32.totalorder %v2404_v14, 0  ;;  %v2405_v44 = vld [vmem:[#allocation16_spill] sm:$0xff]  ;;  %v668_v43 = vmul.f32 %v1634_v45, %v1804_v33  ;;  %v706_v4 = vadd.s32 4294967295, %v2406_v7 }
  0x3e   : > { %v1106_v11 = vadd.f32 %v1098_v28, %v1084_v21  ;;  %v646_v36 = vmul.f32 %v2405_v44, %v1695_v13  ;;  %v497_v38 = vadd.f32 %v489_v56, %v475_v3  ;;  %v632_v47 = vadd.f32 %v624_v62, %v610_v15  ;;  %v2407_v21 = vld [vmem:[#allocation18_spill] sm:$0xff] }
  0x3f   : > { %v1011_v16 = vsel %vm995_vm9, %v971_v0, 0.0  ;;  %v767_v29 = vmul.f32 %v2407_v21, %v1710_v24  ;;  %v781_v9 = vmul.f32 %v1640_v48, %v1712_v25  ;;  %v690_v45 = vmul.f32 %v1647_v50, %v1885_v49  ;;  %v1184_v0 = vld [vmem:[%s1821_s15 + $0x9] sm:$0xff] }
  0x40   : > { %v1019_v35 = vadd.f32 %v1011_v16, %v862_v17  ;;  %v1128_v28 = vadd.f32 %v1120_v12, %v1106_v11  ;;  %v519_v44 = vadd.f32 %v511_v39, %v497_v38  ;;  %v654_v13 = vadd.f32 %v646_v36, %v632_v47  ;;  %v1913_v11 = vld [vmem:[#allocation2 + $0x33] sm:$0xff] }
  0x41   : > { %vm714_vm12 = vcmp.ge.s32.totalorder %v706_v4, 0  ;;  %v789_v17 = vadd.f32 %v781_v9, %v767_v29  ;;  %v803_v12 = vmul.f32 %v1652_v53, %v1714_v26  ;;  %v825_v24 = vmul.f32 %v1655_v54, %v1825_v52 }
  0x42   : > { %v1168_v56 = vsel %vm1152_vm10, %v1128_v28, 0.0  ;;  %v541_v39 = vadd.f32 %v533_v8, %v519_v44  ;;  %v676_v36 = vadd.f32 %v668_v43, %v654_v13  ;;  %v884_v15 = vmul.f32 %v1662_v60, %v1726_v40 }
  0x43   : > { %v1176_v3 = vadd.f32 %v1168_v56, %v1019_v35  ;;  %v811_v62 = vadd.f32 %v803_v12, %v789_v17  ;;  %v847_v41 = vmul.f32 %v1659_v58, %v1900_v63  ;;  %v898_v29 = vmul.f32 %v1665_v61, %v1728_v46  ;;  %v1930_v56 = vld [vmem:[#allocation2 + $0x34] sm:$0xff] }
  0x44   : > { %v920_v9 = vmul.f32 %v1740_v23, %v1735_v59  ;;  %v581_v8 = vsel %vm557_vm11, %v541_v39, 0.0  ;;  %v698_v43 = vadd.f32 %v690_v45, %v676_v36  ;;  %v942_v13 = vmul.f32 %v1743_v22, %v1834_v55 }
  0x45   : > { %v1192_v16 = vmul.f32 %v1184_v0, %v1176_v3  ;;  %v589_v40 = vadd.f32 %v1755_v32, %v581_v8  ;;  %v833_v35 = vadd.f32 %v825_v24, %v811_v62  ;;  %v906_v44 = vadd.f32 %v898_v29, %v884_v15  ;;  %v1943_v15 = vld [vmem:[#allocation2 + $0x38] sm:$0xff]  ;;  %v2410_v8 = vld [vmem:[#allocation12_spill] sm:$0xff] }
  0x46   : > { %v980_v38 = vadd.s32 1, %v2406_v7  ;;  %v738_v47 = vsel %vm714_vm12, %v698_v43, 0.0  ;;  %v964_v28 = vmul.f32 %v1749_v18, %v1913_v11  ;;  %v1041_v45 = vmul.f32 %v1766_v1, %v1761_v30  ;;  %2408 = vst [vmem:[#allocation3_spill] sm:$0xff] %v1943_v15 }
  0x47   : > { %1202 = vst.msk [vmem:[%s1574_s9 + $0x9] sm:$0xff] %vm302_vm0, %v1192_v16  ;;  %v1055_v14 = vmul.f32 %v1769_v37, %v1763_v31  ;;  %v746_v0 = vadd.f32 %v738_v47, %v589_v40  ;;  %v855_v17 = vadd.f32 %v847_v41, %v833_v35  ;;  %v928_v12 = vadd.f32 %v920_v9, %v906_v44  ;;  %v2409_v41 = vld [vmem:[#allocation4_spill] sm:$0xff]  ;;  %v2411_v35 = vld [vmem:[#allocation11_spill] sm:$0xff] }
  0x48   : > { %v1077_v24 = vmul.f32 %v1772_v19, %v1786_v5  ;;  %vm996_vm13 = vcmp.lt.s32.totalorder %v980_v38, 8  ;;  %v1099_v3 = vmul.f32 %v1781_v42, %v1851_v27  ;;  %v1137_v39 = vadd.s32 2, %v2406_v7 }
  0x49   : > { %v1063_v4 = vadd.f32 %v1055_v14, %v1041_v45  ;;  %v950_v36 = vadd.f32 %v942_v13, %v928_v12  ;;  %v1121_v30 = vmul.f32 %v1791_v20, %v1930_v56  ;;  %v454_v62 = vmul.f32 %v2393_v34, %v2395_v57  ;;  %v2412_v45 = vld [vmem:[#allocation15_spill] sm:$0xff]  ;;  %v2413_v14 = vld [vmem:[#allocation24_spill] sm:$0xff] }
  0x4a   : > { %v468_v29 = vmul.f32 %v2409_v41, %v2397_v6  ;;  %v863_v9 = vadd.f32 %v855_v17, %v746_v0  ;;  %vm1153_vm14 = vcmp.lt.s32.totalorder %v1137_v39, 8  ;;  %v490_v43 = vmul.f32 %v2410_v8, %v1793_v51  ;;  %v2414_v12 = vld [vmem:[#allocation8_spill] sm:$0xff]  ;;  %v2415_v0 = vld [vmem:[#allocation25_spill] sm:$0xff] }
  0x4b   : > { %v1085_v16 = vadd.f32 %v1077_v24, %v1063_v4  ;;  %v972_v40 = vadd.f32 %v964_v28, %v950_v36  ;;  %v512_v13 = vmul.f32 %v2399_v2, %v1861_v10  ;;  %v550_v44 = vadd.s32 4294967294, %v2411_v35  ;;  %v2416_v17 = vld [vmem:[#allocation9_spill] sm:$0xff] }
  0x4c   : > { %v476_v7 = vadd.f32 %v468_v29, %v454_v62  ;;  %v534_v57 = vmul.f32 %v2412_v45, %v1943_v15  ;;  %v611_v41 = vmul.f32 %v2414_v12, %v2413_v14  ;;  %v625_v24 = vmul.f32 %v2416_v17, %v2415_v0  ;;  %v1961_v36 = vld [vmem:[#allocation2 + $0x39] sm:$0xff]  ;;  %v2417_v62 = vld [vmem:[#allocation16_spill] sm:$0xff] }
  0x4d   : > { %v1107_v47 = vadd.f32 %v1099_v3, %v1085_v16  ;;  %v1012_v4 = vsel %vm996_vm13, %v972_v40, 0.0  ;;  %vm558_vm15 = vcmp.ge.s32.totalorder %v550_v44, 0  ;;  %v647_v29 = vmul.f32 %v2417_v62, %v1804_v33  ;;  %v2418_v45 = vld [vmem:[#allocation17_spill] sm:$0xff] }
  0x4e   : > { %v498_v28 = vadd.f32 %v490_v43, %v476_v7  ;;  %v1020_v3 = vadd.f32 %v1012_v4, %v863_v9  ;;  %v633_v2 = vadd.f32 %v625_v24, %v611_v41  ;;  %v669_v15 = vmul.f32 %v2418_v45, %v1885_v49  ;;  %v1185_v7 = vld [vmem:[%s1821_s15 + $0x11] sm:$0xff]  ;;  %v1976_v41 = vld [vmem:[#allocation2 + $0x3a] sm:$0xff] }
  0x4f   : > { %v1129_v16 = vadd.f32 %v1121_v30, %v1107_v47  ;;  %v707_v12 = vadd.s32 4294967295, %v2411_v35  ;;  %v768_v38 = vmul.f32 %v2407_v21, %v1712_v25  ;;  %v782_v43 = vmul.f32 %v1640_v48, %v1714_v26 }
  0x50   : > { %v520_v14 = vadd.f32 %v512_v13, %v498_v28  ;;  %v655_v17 = vadd.f32 %v647_v29, %v633_v2  ;;  %v691_v30 = vmul.f32 %v1647_v50, %v1961_v36  ;;  %v804_v9 = vmul.f32 %v1652_v53, %v1825_v52 }
  0x51   : > { %v1169_v40 = vsel %vm1153_vm14, %v1129_v16, 0.0  ;;  %v790_v24 = vadd.f32 %v782_v43, %v768_v38  ;;  %v826_v25 = vmul.f32 %v1655_v54, %v1900_v63  ;;  %vm715_vm1 = vcmp.ge.s32.totalorder %v707_v12, 0 }
  0x52   : > { %v1177_v13 = vadd.f32 %v1169_v40, %v1020_v3  ;;  %v542_v47 = vadd.f32 %v534_v57, %v520_v14  ;;  %v677_v4 = vadd.f32 %v669_v15, %v655_v17  ;;  %v885_v2 = vmul.f32 %v1662_v60, %v1728_v46  ;;  %v1989_v3 = vld [vmem:[#allocation2 + $0x3b] sm:$0xff] }
  0x53   : > { %v899_v39 = vmul.f32 %v1665_v61, %v1735_v59  ;;  %v812_v16 = vadd.f32 %v804_v9, %v790_v24  ;;  %v848_v57 = vmul.f32 %v1659_v58, %v1976_v41  ;;  %v921_v17 = vmul.f32 %v1740_v23, %v1834_v55 }
  0x54   : > { %v1193_v28 = vmul.f32 %v1185_v7, %v1177_v13  ;;  %v582_v29 = vsel %vm558_vm15, %v542_v47, 0.0  ;;  %v699_v38 = vadd.f32 %v691_v30, %v677_v4  ;;  %v943_v44 = vmul.f32 %v1743_v22, %v1913_v11  ;;  %v2004_v13 = vld [vmem:[#allocation2 + $0x3c] sm:$0xff] }
  0x55   : > { %v590_v14 = vadd.f32 %v1755_v32, %v582_v29  ;;  %v907_v15 = vadd.f32 %v899_v39, %v885_v2  ;;  %v834_v46 = vadd.f32 %v826_v25, %v812_v16  ;;  %v981_v43 = vadd.s32 1, %v2411_v35 }
  0x56   : > { %1203 = vst.msk [vmem:[%s1574_s9 + $0x11] sm:$0xff] %vm302_vm0, %v1193_v28  ;;  %v1042_v40 = vmul.f32 %v1766_v1, %v1763_v31  ;;  %v739_v7 = vsel %vm715_vm1, %v699_v38, 0.0  ;;  %v965_v30 = vmul.f32 %v1749_v18, %v1989_v3  ;;  %v1056_v47 = vmul.f32 %v1769_v37, %v1786_v5 }
  0x57   : > { %v929_v9 = vadd.f32 %v921_v17, %v907_v15  ;;  %v747_v24 = vadd.f32 %v739_v7, %v590_v14  ;;  %v856_v25 = vadd.f32 %v848_v57, %v834_v46  ;;  %vm997_vm2 = vcmp.lt.s32.totalorder %v981_v43, 8  ;;  %v2017_v14 = vld [vmem:[#allocation2 + $0x40] sm:$0xff]  ;;  %v2419_v57 = vld [vmem:[#allocation4_spill] sm:$0xff] }
  0x58   : > { %v1078_v4 = vmul.f32 %v1772_v19, %v1851_v27  ;;  %v1064_v39 = vadd.f32 %v1056_v47, %v1042_v40  ;;  %v1100_v31 = vmul.f32 %v1781_v42, %v1930_v56  ;;  %v1138_v12 = vadd.s32 2, %v2411_v35  ;;  %v2420_v35 = vld [vmem:[#allocation3_spill] sm:$0xff]  ;;  %v2421_v40 = vld [vmem:[#allocation13_spill] sm:$0xff] }
  0x59   : > { %v951_v2 = vadd.f32 %v943_v44, %v929_v9  ;;  %v864_v28 = vadd.f32 %v856_v25, %v747_v24  ;;  %v1122_v29 = vmul.f32 %v1791_v20, %v2004_v13  ;;  %v455_v16 = vmul.f32 %v2393_v34, %v2397_v6  ;;  %v2422_v9 = vld [vmem:[#allocation14_spill] sm:$0xff]  ;;  %v2423_v24 = vld [vmem:[#allocation8_spill] sm:$0xff] }
  0x5a   : > { %v469_v38 = vmul.f32 %v2419_v57, %v1793_v51  ;;  %v1086_v17 = vadd.f32 %v1078_v4, %v1064_v39  ;;  %vm1154_vm3 = vcmp.lt.s32.totalorder %v1138_v12, 8  ;;  %v491_v46 = vmul.f32 %v2410_v8, %v1861_v10  ;;  %v2424_v57 = vld [vmem:[#allocation15_spill] sm:$0xff] }
  0x5b   : > { %v973_v15 = vadd.f32 %v965_v30, %v951_v2  ;;  %v513_v7 = vmul.f32 %v2421_v40, %v2420_v35  ;;  %v551_v47 = vadd.s32 4294967294, %v2422_v9  ;;  %v612_v6 = vmul.f32 %v2423_v24, %v2415_v0  ;;  %v2031_v4 = vld [vmem:[#allocation2 + $0x41] sm:$0xff]  ;;  %v2425_v2 = vld [vmem:[#allocation9_spill] sm:$0xff] }
  0x5c   : > { %v477_v44 = vadd.f32 %v469_v38, %v455_v16  ;;  %v1108_v20 = vadd.f32 %v1100_v31, %v1086_v17  ;;  %v535_v30 = vmul.f32 %v2424_v57, %v2017_v14  ;;  %v626_v39 = vmul.f32 %v2425_v2, %v1804_v33 }
  0x5d   : > { %v1013_v25 = vsel %vm997_vm2, %v973_v15, 0.0  ;;  %vm559_vm4 = vcmp.ge.s32.totalorder %v551_v47, 0  ;;  %v648_v40 = vmul.f32 %v2417_v62, %v1885_v49  ;;  %v670_v43 = vmul.f32 %v2418_v45, %v1961_v36 }
  0x5e   : > { %v1021_v16 = vadd.f32 %v1013_v25, %v864_v28  ;;  %v499_v38 = vadd.f32 %v491_v46, %v477_v44  ;;  %v1130_v8 = vadd.f32 %v1122_v29, %v1108_v20  ;;  %v634_v0 = vadd.f32 %v626_v39, %v612_v6  ;;  %v2044_v28 = vld [vmem:[#allocation2 + $0x42] sm:$0xff]  ;;  %v1186_v29 = vld [vmem:[%s1821_s15 + $0x19] sm:$0xff] }
  0x5f   : > { %v708_v31 = vadd.s32 4294967295, %v2422_v9  ;;  %v692_v17 = vmul.f32 %v1647_v50, %v2031_v4  ;;  %v769_v2 = vmul.f32 %v2407_v21, %v1714_v26  ;;  %v783_v46 = vmul.f32 %v1640_v48, %v1825_v52 }
  0x60   : > { %v521_v15 = vadd.f32 %v513_v7, %v499_v38  ;;  %v1170_v20 = vsel %vm1154_vm3, %v1130_v8, 0.0  ;;  %v656_v44 = vadd.f32 %v648_v40, %v634_v0  ;;  %v805_v6 = vmul.f32 %v1652_v53, %v1900_v63 }
  0x61   : > { %vm716_vm5 = vcmp.ge.s32.totalorder %v708_v31, 0  ;;  %v1178_v7 = vadd.f32 %v1170_v20, %v1021_v16  ;;  %v791_v39 = vadd.f32 %v783_v46, %v769_v2  ;;  %v827_v26 = vmul.f32 %v1655_v54, %v1976_v41 }
  0x62   : > { %v543_v25 = vadd.f32 %v535_v30, %v521_v15  ;;  %v678_v38 = vadd.f32 %v670_v43, %v656_v44  ;;  %v849_v50 = vmul.f32 %v1659_v58, %v2044_v28  ;;  %v886_v8 = vmul.f32 %v1662_v60, %v1735_v59  ;;  %v2061_v30 = vld [vmem:[#allocation2 + $0x43] sm:$0xff] }
  0x63   : > { %v900_v12 = vmul.f32 %v1665_v61, %v1834_v55  ;;  %v1194_v40 = vmul.f32 %v1186_v29, %v1178_v7  ;;  %v813_v16 = vadd.f32 %v805_v6, %v791_v39  ;;  %v922_v2 = vmul.f32 %v1740_v23, %v1913_v11 }
  0x64   : > { %v583_v0 = vsel %vm559_vm4, %v543_v25, 0.0  ;;  %v700_v15 = vadd.f32 %v692_v17, %v678_v38  ;;  %v944_v20 = vmul.f32 %v1743_v22, %v1989_v3  ;;  %v982_v29 = vadd.s32 1, %v2422_v9 }
  0x65   : > { %v591_v43 = vadd.f32 %v1755_v32, %v583_v0  ;;  %v908_v46 = vadd.f32 %v900_v12, %v886_v8  ;;  %1204 = vst.msk [vmem:[%s1574_s9 + $0x19] sm:$0xff] %vm302_vm0, %v1194_v40  ;;  %v835_v59 = vadd.f32 %v827_v26, %v813_v16  ;;  %v1043_v47 = vmul.f32 %v1766_v1, %v1786_v5  ;;  %v2080_v26 = vld [vmem:[#allocation2 + $0x44] sm:$0xff]  ;;  %v2426_v40 = vld [vmem:[#allocation5_spill] sm:$0xff] }
  0x66   : > { %v1057_v44 = vmul.f32 %v1769_v37, %v1851_v27  ;;  %v740_v6 = vsel %vm716_vm5, %v700_v15, 0.0  ;;  %v966_v17 = vmul.f32 %v1749_v18, %v2061_v30  ;;  %v1079_v25 = vmul.f32 %v1772_v19, %v1930_v56 }
  0x67   : > { %v930_v7 = vadd.f32 %v922_v2, %v908_v46  ;;  %v748_v39 = vadd.f32 %v740_v6, %v591_v43  ;;  %v857_v38 = vadd.f32 %v849_v50, %v835_v59  ;;  %v1101_v5 = vmul.f32 %v1781_v42, %v2004_v13  ;;  %v2427_v50 = vld [vmem:[#allocation4_spill] sm:$0xff]  ;;  %v2092_v46 = vld [vmem:[#allocation2 + $0x48] sm:$0xff] }
  0x68   : > { %v1065_v8 = vadd.f32 %v1057_v44, %v1043_v47  ;;  %vm998_vm6 = vcmp.lt.s32.totalorder %v982_v29, 8  ;;  %v1139_v31 = vadd.s32 2, %v2422_v9  ;;  %v2086_v0 = vand.u32 7, %v2426_v40  ;;  %v2428_v47 = vld [vmem:[#allocation28_spill] sm:$0xff] }
  0x69   : > { %v952_v12 = vadd.f32 %v944_v20, %v930_v7  ;;  %v865_v16 = vadd.f32 %v857_v38, %v748_v39  ;;  %v456_v15 = vmul.f32 %v2393_v34, %v1793_v51  ;;  %v470_v43 = vmul.f32 %v2427_v50, %v1861_v10  ;;  %v2429_v9 = vld [vmem:[#allocation12_spill] sm:$0xff] }
  0x6a   : > { %v1087_v2 = vadd.f32 %v1079_v25, %v1065_v8  ;;  %v1123_v20 = vmul.f32 %v2428_v47, %v2080_v26  ;;  %vm1155_vm7 = vcmp.lt.s32.totalorder %v1139_v31, 8  ;;  %v492_v44 = vmul.f32 %v2429_v9, %v2420_v35  ;;  %v2430_v25 = vld [vmem:[#allocation13_spill] sm:$0xff] }
  0x6b   : > { %v974_v59 = vadd.f32 %v966_v17, %v952_v12  ;;  %v478_v7 = vadd.f32 %v470_v43, %v456_v15  ;;  %v514_v39 = vmul.f32 %v2430_v25, %v2017_v14  ;;  %v552_v51 = vadd.s32 4294967294, %v2086_v0  ;;  %v2431_v12 = vld [vmem:[#allocation9_spill] sm:$0xff]  ;;  %v2108_v15 = vld [vmem:[#allocation2 + $0x49] sm:$0xff] }
  0x6c   : > { %v1109_v6 = vadd.f32 %v1101_v5, %v1087_v2  ;;  %v536_v17 = vmul.f32 %v2424_v57, %v2092_v46  ;;  %v613_v8 = vmul.f32 %v2423_v24, %v1804_v33  ;;  %v627_v40 = vmul.f32 %v2431_v12, %v1885_v49  ;;  %v1187_v24 = vld [vmem:[%s1821_s15 + $0x21] sm:$0xff] }
  0x6d   : > { %v1014_v38 = vsel %vm998_vm6, %v974_v59, 0.0  ;;  %v500_v2 = vadd.f32 %v492_v44, %v478_v7  ;;  %v649_v43 = vmul.f32 %v2417_v62, %v1961_v36  ;;  %vm560_vm8 = vcmp.ge.s32.totalorder %v552_v51, 0  ;;  %v2432_v7 = vld [vmem:[#allocation19_spill] sm:$0xff] }
  0x6e   : > { %v1022_v9 = vadd.f32 %v1014_v38, %v865_v16  ;;  %v1131_v5 = vadd.f32 %v1123_v20, %v1109_v6  ;;  %v635_v29 = vadd.f32 %v627_v40, %v613_v8  ;;  %v671_v59 = vmul.f32 %v2418_v45, %v2031_v4  ;;  %v2123_v8 = vld [vmem:[#allocation2 + $0x4a] sm:$0xff] }
  0x6f   : > { %v709_v57 = vadd.s32 4294967295, %v2086_v0  ;;  %v522_v25 = vadd.f32 %v514_v39, %v500_v2  ;;  %v770_v16 = vmul.f32 %v2407_v21, %v1825_v52  ;;  %v784_v20 = vmul.f32 %v1640_v48, %v1900_v63 }
  0x70   : > { %v1171_v33 = vsel %vm1155_vm7, %v1131_v5, 0.0  ;;  %v657_v6 = vadd.f32 %v649_v43, %v635_v29  ;;  %v693_v38 = vmul.f32 %v2432_v7, %v2108_v15  ;;  %v806_v39 = vmul.f32 %v1652_v53, %v1976_v41 }
  0x71   : > { %v1179_v44 = vadd.f32 %v1171_v33, %v1022_v9  ;;  %vm717_vm9 = vcmp.ge.s32.totalorder %v709_v57, 0  ;;  %v544_v40 = vadd.f32 %v536_v17, %v522_v25  ;;  %v792_v31 = vadd.f32 %v784_v20, %v770_v16  ;;  %v2136_v17 = vld [vmem:[#allocation2 + $0x4b] sm:$0xff] }
  0x72   : > { %v828_v52 = vmul.f32 %v1655_v54, %v2044_v28  ;;  %v679_v2 = vadd.f32 %v671_v59, %v657_v6  ;;  %v887_v9 = vmul.f32 %v1662_v60, %v1834_v55  ;;  %v901_v43 = vmul.f32 %v1665_v61, %v1913_v11 }
  0x73   : > { %v1195_v5 = vmul.f32 %v1187_v24, %v1179_v44  ;;  %v584_v29 = vsel %vm560_vm8, %v544_v40, 0.0  ;;  %v814_v33 = vadd.f32 %v806_v39, %v792_v31  ;;  %v850_v25 = vmul.f32 %v1659_v58, %v2123_v8 }
  0x74   : > { %v923_v16 = vmul.f32 %v1740_v23, %v1989_v3  ;;  %v592_v24 = vadd.f32 %v1755_v32, %v584_v29  ;;  %v701_v59 = vadd.f32 %v693_v38, %v679_v2  ;;  %v909_v55 = vadd.f32 %v901_v43, %v887_v9  ;;  %v2155_v43 = vld [vmem:[#allocation2 + $0x4c] sm:$0xff] }
  0x75   : > { %1205 = vst.msk [vmem:[%s1574_s9 + $0x21] sm:$0xff] %vm302_vm0, %v1195_v5  ;;  %v945_v20 = vmul.f32 %v1743_v22, %v2061_v30  ;;  %v836_v51 = vadd.f32 %v828_v52, %v814_v33  ;;  %v983_v44 = vadd.s32 1, %v2086_v0  ;;  %v1044_v6 = vmul.f32 %v1766_v1, %v1851_v27  ;;  %v2433_v33 = vld [vmem:[#allocation6_spill] sm:$0xff] }
  0x76   : > { %v1058_v40 = vmul.f32 %v1769_v37, %v1930_v56  ;;  %v741_v31 = vsel %vm717_vm9, %v701_v59, 0.0  ;;  %v931_v39 = vadd.f32 %v923_v16, %v909_v55  ;;  %v967_v5 = vmul.f32 %v1749_v18, %v2136_v17 }
  0x77   : > { %v1080_v38 = vmul.f32 %v1772_v19, %v2004_v13  ;;  %v749_v2 = vadd.f32 %v741_v31, %v592_v24  ;;  %v858_v9 = vadd.f32 %v850_v25, %v836_v51  ;;  %v1102_v27 = vmul.f32 %v1781_v42, %v2080_v26  ;;  %v2167_v24 = vld [vmem:[#allocation2 + $0x50] sm:$0xff] }
  0x78   : > { %v1066_v52 = vadd.f32 %v1058_v40, %v1044_v6  ;;  %v953_v29 = vadd.f32 %v945_v20, %v931_v39  ;;  %vm999_vm10 = vcmp.lt.s32.totalorder %v983_v44, 8  ;;  %v1140_v57 = vadd.s32 2, %v2086_v0  ;;  %v2434_v0 = vld [vmem:[#allocation12_spill] sm:$0xff]  ;;  %v2435_v39 = vld [vmem:[#allocation13_spill] sm:$0xff] }
  0x79   : > { %v2161_v16 = vand.u32 7, %v2433_v33  ;;  %v866_v59 = vadd.f32 %v858_v9, %v749_v2  ;;  %v457_v19 = vmul.f32 %v2393_v34, %v1861_v10  ;;  %v471_v25 = vmul.f32 %v2427_v50, %v2420_v35  ;;  %v2436_v50 = vld [vmem:[#allocation15_spill] sm:$0xff]  ;;  %v2437_v2 = vld [vmem:[#allocation8_spill] sm:$0xff] }
  0x7a   : > { %v1088_v55 = vadd.f32 %v1080_v38, %v1066_v52  ;;  %v975_v51 = vadd.f32 %v967_v5, %v953_v29  ;;  %v1124_v20 = vmul.f32 %v2428_v47, %v2155_v43  ;;  %vm1156_vm11 = vcmp.lt.s32.totalorder %v1140_v57, 8 }
  0x7b   : > { %v493_v6 = vmul.f32 %v2434_v0, %v2017_v14  ;;  %v479_v31 = vadd.f32 %v471_v25, %v457_v19  ;;  %v515_v38 = vmul.f32 %v2435_v39, %v2092_v46  ;;  %v553_v10 = vadd.s32 4294967294, %v2161_v16  ;;  %v1188_v0 = vld [vmem:[%s1821_s15 + $0x29] sm:$0xff] }
  0x7c   : > { %v1110_v40 = vadd.f32 %v1102_v27, %v1088_v55  ;;  %v1015_v34 = vsel %vm999_vm10, %v975_v51, 0.0  ;;  %v537_v5 = vmul.f32 %v2436_v50, %v2167_v24  ;;  %v614_v9 = vmul.f32 %v2437_v2, %v1885_v49  ;;  %v2185_v55 = vld [vmem:[#allocation2 + $0x51] sm:$0xff] }
  0x7d   : > { %v628_v52 = vmul.f32 %v2431_v12, %v1961_v36  ;;  %v1023_v29 = vadd.f32 %v1015_v34, %v866_v59  ;;  %v501_v19 = vadd.f32 %v493_v6, %v479_v31  ;;  %v650_v33 = vmul.f32 %v2417_v62, %v2031_v4  ;;  %v2213_v2 = vld [vmem:[#allocation2 + $0x53] sm:$0xff] }
  0x7e   : > { %v1132_v27 = vadd.f32 %v1124_v20, %v1110_v40  ;;  %vm561_vm12 = vcmp.ge.s32.totalorder %v553_v10, 0  ;;  %v672_v25 = vmul.f32 %v2418_v45, %v2108_v15  ;;  %v710_v51 = vadd.s32 4294967295, %v2161_v16  ;;  %v2198_v45 = vld [vmem:[#allocation2 + $0x52] sm:$0xff] }
  0x7f   : > { %v636_v44 = vadd.f32 %v628_v52, %v614_v9  ;;  %v523_v39 = vadd.f32 %v515_v38, %v501_v19  ;;  %v771_v12 = vmul.f32 %v2407_v21, %v1900_v63  ;;  %v785_v59 = vmul.f32 %v1640_v48, %v1976_v41 }
  0x80   : > { %v1172_v49 = vsel %vm1156_vm11, %v1132_v27, 0.0  ;;  %v694_v6 = vmul.f32 %v2432_v7, %v2185_v55  ;;  %vm718_vm13 = vcmp.ge.s32.totalorder %v710_v51, 0  ;;  %v807_v31 = vmul.f32 %v1652_v53, %v2044_v28 }
  0x81   : > { %v1180_v62 = vadd.f32 %v1172_v49, %v1023_v29  ;;  %v658_v20 = vadd.f32 %v650_v33, %v636_v44  ;;  %v545_v40 = vadd.f32 %v537_v5, %v523_v39  ;;  %v793_v57 = vadd.f32 %v785_v59, %v771_v12  ;;  %v2438_v33 = vld [vmem:[#allocation27_spill] sm:$0xff]  ;;  %v2230_v39 = vld [vmem:[#allocation2 + $0x54] sm:$0xff] }
  0x82   : > { %v829_v21 = vmul.f32 %v1655_v54, %v2123_v8  ;;  %v888_v48 = vmul.f32 %v1662_v60, %v1913_v11  ;;  %v902_v7 = vmul.f32 %v1665_v61, %v1989_v3  ;;  %v851_v5 = vmul.f32 %v1659_v58, %v2198_v45  ;;  %v2439_v59 = vld [vmem:[#allocation7_spill] sm:$0xff] }
  0x83   : > { %v1196_v63 = vmul.f32 %v1188_v0, %v1180_v62  ;;  %v680_v38 = vadd.f32 %v672_v25, %v658_v20  ;;  %v585_v34 = vsel %vm561_vm12, %v545_v40, 0.0  ;;  %v815_v50 = vadd.f32 %v807_v31, %v793_v57  ;;  %v1428_v40 = vld [vmem:[%s1556_s27] ss:$0 sm:$0xff]  ;;  %v1429_v31 = vld [vmem:[%s1556_s27 + $0x5] ss:$0 sm:$0xff] }
  0x84   : > { %v924_v53 = vmul.f32 %v1740_v23, %v2061_v30  ;;  %v593_v54 = vadd.f32 %v1755_v32, %v585_v34  ;;  %v910_v60 = vadd.f32 %v902_v7, %v888_v48  ;;  %v946_v61 = vmul.f32 %v1743_v22, %v2136_v17  ;;  %v1430_v48 = vld [vmem:[%s1556_s27 + $0xa] ss:$0 sm:$0xff] }
  0x85   : > { %1206 = vst.msk [vmem:[%s1574_s9 + $0x29] sm:$0xff] %vm302_vm0, %v1196_v63  ;;  %v702_v9 = vadd.f32 %v694_v6, %v680_v38  ;;  %v837_v11 = vadd.f32 %v829_v21, %v815_v50  ;;  %v984_v10 = vadd.s32 1, %v2161_v16  ;;  %v1045_v58 = vmul.f32 %v1766_v1, %v1930_v56  ;;  %v525_v63 = vld [vmem:[#allocation2 + $0x58] sm:$0xff] }
  0x86   : > { %v1059_v52 = vmul.f32 %v1769_v37, %v2004_v13  ;;  %v932_v27 = vadd.f32 %v924_v53, %v910_v60  ;;  %v968_v19 = vmul.f32 %v1749_v18, %v2213_v2  ;;  %v1081_v44 = vmul.f32 %v2438_v33, %v2080_v26  ;;  %v1433_v60 = vld [vmem:[%s1556_s27 + $0x1] ss:$0 sm:$0xff] }
  0x87   : > { %v742_v29 = vsel %vm718_vm13, %v702_v9, 0.0  ;;  %v859_v49 = vadd.f32 %v851_v5, %v837_v11  ;;  %v1103_v56 = vmul.f32 %v1781_v42, %v2155_v43  ;;  %vm1000_vm14 = vcmp.lt.s32.totalorder %v984_v10, 8  ;;  %v1431_v5 = vld [vmem:[%s1556_s27 + $0xf] ss:$0 sm:$0xff]  ;;  %v1434_v11 = vld [vmem:[%s1556_s27 + $0x6] ss:$0 sm:$0xff] }
  0x88   : > { %v750_v25 = vadd.f32 %v742_v29, %v593_v54  ;;  %v1067_v0 = vadd.f32 %v1059_v52, %v1045_v58  ;;  %v954_v51 = vadd.f32 %v946_v61, %v932_v27  ;;  %v1141_v12 = vadd.s32 2, %v2161_v16  ;;  %v1432_v54 = vld [vmem:[%s1556_s27 + $0x14] ss:$0 sm:$0xff]  ;;  %v682_v10 = vld [vmem:[#allocation2 + $0x59] sm:$0xff] }
  0x89   : > { %v2236_v62 = vand.u32 7, %v2439_v59  ;;  %v458_v57 = vmul.f32 %v1428_v40, %v2420_v35  ;;  %v472_v21 = vmul.f32 %v1429_v31, %v2017_v14  ;;  %v1125_v16 = vmul.f32 %v2428_v47, %v2230_v39  ;;  %v1438_v59 = vld [vmem:[%s1556_s27 + $0x7] ss:$0 sm:$0xff]  ;;  %v1439_v40 = vld [vmem:[%s1556_s27 + $0x15] ss:$0 sm:$0xff]  ;;  %v839_v31 = vld [vmem:[#allocation2 + $0x5a] sm:$0xff] }
  0x8a   : > { %v867_v20 = vadd.f32 %v859_v49, %v750_v25  ;;  %v1089_v6 = vadd.f32 %v1081_v44, %v1067_v0  ;;  %v976_v38 = vadd.f32 %v968_v19, %v954_v51  ;;  %vm1157_vm15 = vcmp.lt.s32.totalorder %v1141_v12, 8  ;;  %v1436_v44 = vld [vmem:[%s1556_s27 + $0x10] ss:$0 sm:$0xff] }
  0x8b   : > { %v494_v7 = vmul.f32 %v1430_v48, %v2092_v46  ;;  %v480_v50 = vadd.f32 %v472_v21, %v458_v57  ;;  %v516_v35 = vmul.f32 %v1431_v5, %v2167_v24  ;;  %v554_v53 = vadd.s32 4294967294, %v2236_v62  ;;  %v1435_v24 = vld [vmem:[%s1556_s27 + $0xb] ss:$0 sm:$0xff] }
  0x8c   : > { %v1111_v34 = vadd.f32 %v1103_v56, %v1089_v6  ;;  %v1016_v14 = vsel %vm1000_vm14, %v976_v38, 0.0  ;;  %v538_v9 = vmul.f32 %v1432_v54, %v525_v63  ;;  %v615_v61 = vmul.f32 %v1433_v60, %v1961_v36  ;;  %v1437_v56 = vld [vmem:[%s1556_s27 + $0x2] ss:$0 sm:$0xff]  ;;  %v1441_v38 = vld [vmem:[%s1556_s27 + $0x11] ss:$0 sm:$0xff] }
  0x8d   : > { %v629_v46 = vmul.f32 %v1434_v11, %v2031_v4  ;;  %v1024_v58 = vadd.f32 %v1016_v14, %v867_v20  ;;  %v502_v29 = vadd.f32 %v494_v7, %v480_v50  ;;  %v651_v27 = vmul.f32 %v1435_v24, %v2108_v15  ;;  %v1189_v4 = vld [vmem:[%s1821_s15 + $0x31] sm:$0xff] }
  0x8e   : > { %v1133_v52 = vadd.f32 %v1125_v16, %v1111_v34  ;;  %vm562_vm1 = vcmp.ge.s32.totalorder %v554_v53, 0  ;;  %v673_v25 = vmul.f32 %v1436_v44, %v2185_v55  ;;  %v711_v36 = vadd.s32 4294967295, %v2236_v62  ;;  %v1440_v55 = vld [vmem:[%s1556_s27 + $0xc] ss:$0 sm:$0xff]  ;;  %v1443_v34 = vld [vmem:[%s1556_s27 + $0x8] ss:$0 sm:$0xff] }
  0x8f   : > { %v637_v19 = vadd.f32 %v629_v46, %v615_v61  ;;  %v524_v0 = vadd.f32 %v516_v35, %v502_v29  ;;  %v772_v51 = vmul.f32 %v1437_v56, %v1976_v41  ;;  %v786_v15 = vmul.f32 %v1438_v59, %v2044_v28  ;;  %v1442_v28 = vld [vmem:[%s1556_s27 + $0x3] ss:$0 sm:$0xff] }
  0x90   : > { %v1173_v49 = vsel %vm1157_vm15, %v1133_v52, 0.0  ;;  %v695_v57 = vmul.f32 %v1439_v40, %v682_v10  ;;  %v808_v12 = vmul.f32 %v1440_v55, %v2123_v8  ;;  %vm719_vm2 = vcmp.ge.s32.totalorder %v711_v36, 0  ;;  %v1444_v8 = vld [vmem:[%s1556_s27 + $0x16] ss:$0 sm:$0xff]  ;;  %v1113_v52 = vld [vmem:[#allocation2 + $0x5c] sm:$0xff] }
  0x91   : > { %v1181_v20 = vadd.f32 %v1173_v49, %v1024_v58  ;;  %v659_v6 = vadd.f32 %v651_v27, %v637_v19  ;;  %v546_v21 = vadd.f32 %v538_v9, %v524_v0  ;;  %v794_v63 = vadd.f32 %v786_v15, %v772_v51  ;;  %v956_v9 = vld [vmem:[#allocation2 + $0x5b] sm:$0xff] }
  0x92   : > { %v830_v41 = vmul.f32 %v1441_v38, %v2198_v45  ;;  %v889_v7 = vmul.f32 %v1442_v28, %v1989_v3  ;;  %v903_v50 = vmul.f32 %v1443_v34, %v2061_v30  ;;  %v852_v14 = vmul.f32 %v1444_v8, %v839_v31 }
  0x93   : > { %v1197_v16 = vmul.f32 %v1189_v4, %v1181_v20  ;;  %v681_v48 = vadd.f32 %v673_v25, %v659_v6  ;;  %v586_v5 = vsel %vm562_vm1, %v546_v21, 0.0  ;;  %v816_v35 = vadd.f32 %v808_v12, %v794_v63  ;;  %v1190_v25 = vld [vmem:[%s1821_s15 + $0x39] sm:$0xff] }
  0x94   : > { %v925_v54 = vmul.f32 %v1740_v23, %v2136_v17  ;;  %v594_v45 = vadd.f32 %v1755_v32, %v586_v5  ;;  %v911_v61 = vadd.f32 %v903_v50, %v889_v7  ;;  %v947_v3 = vmul.f32 %v1743_v22, %v2213_v2 }
  0x95   : > { %1207 = vst.msk [vmem:[%s1574_s9 + $0x31] sm:$0xff] %vm302_vm0, %v1197_v16  ;;  %v703_v60 = vadd.f32 %v695_v57, %v681_v48  ;;  %v838_v11 = vadd.f32 %v830_v41, %v816_v35  ;;  %v985_v30 = vadd.s32 1, %v2236_v62  ;;  %v1046_v53 = vmul.f32 %v1766_v1, %v2004_v13 }
  0x96   : > { %v1060_v46 = vmul.f32 %v1769_v37, %v2080_v26  ;;  %v933_v17 = vadd.f32 %v925_v54, %v911_v61  ;;  %v969_v58 = vmul.f32 %v1749_v18, %v956_v9  ;;  %v1082_v32 = vmul.f32 %v2438_v33, %v2155_v43 }
  0x97   : > { %v743_v23 = vsel %vm719_vm2, %v703_v60, 0.0  ;;  %v860_v22 = vadd.f32 %v852_v14, %v838_v11  ;;  %v1104_v24 = vmul.f32 %v1781_v42, %v2230_v39  ;;  %v1142_v37 = vadd.s32 2, %v2236_v62 }
  0x98   : > { %v751_v29 = vadd.f32 %v743_v23, %v594_v45  ;;  %v1068_v2 = vadd.f32 %v1060_v46, %v1046_v53  ;;  %v955_v1 = vadd.f32 %v947_v3, %v933_v17  ;;  %vm1001_vm3 = vcmp.lt.s32.totalorder %v985_v30, 8 }
  0x99   : > { %v1126_v18 = vmul.f32 %v2428_v47, %v1113_v52  ;;  %vm1158_vm4 = vcmp.lt.s32.totalorder %v1142_v37, 8 }
  0x9a   : > { %v868_v13 = vadd.f32 %v860_v22, %v751_v29  ;;  %v1090_v26 = vadd.f32 %v1082_v32, %v1068_v2  ;;  %v977_v27 = vadd.f32 %v969_v58, %v955_v1 }
  0x9c   : > { %v1112_v10 = vadd.f32 %v1104_v24, %v1090_v26  ;;  %v1017_v43 = vsel %vm1001_vm3, %v977_v27, 0.0 }
  0x9d   : > { %v1025_v33 = vadd.f32 %v1017_v43, %v868_v13 }
  0x9e   : > { %v1134_v19 = vadd.f32 %v1126_v18, %v1112_v10 }
  0xa0   : > { %v1174_v44 = vsel %vm1158_vm4, %v1134_v19, 0.0 }
  0xa1   : > { %v1182_v36 = vadd.f32 %v1174_v44, %v1025_v33 }
  0xa3   : > { %v1198_v49 = vmul.f32 %v1190_v25, %v1182_v36 }
  0xa5   : > { %1208 = vst.msk [vmem:[%s1574_s9 + $0x39] sm:$0xff] %vm302_vm0, %v1198_v49 }
  0xa6 PF: > { %s14_s19 = sadd.s32 1, %s1483_s19   ;;  %s2440_s15 = smov %s1475_s17 }
  0xa7   : > { %p11_p7 = scmp.ge.s32.totalorder %s14_s19, 8   ;;  %s2441_s16 = smov %s1479_s18 }
  0xa8   : > { %s2442_s17 = smov %s2445_s20  ;;  %s2443_s18 = smov %s2449_s21 }
  0xa9   :  { %13 = sbr.rel (!%p11_p7) target bundleno = 3 (0x3), region = 75 }

</bundles_post_ra>
